<compile_context>
chip_gen: v7x
topology: tpu7x:2x2x1
jax: 0.10.0
libtpu: 0.0.40
codegen_flags: <defaults>
</compile_context>

<pallas_src>
import functools

import jax
import jax.numpy as jnp
from jax.experimental import pallas as pl
from jax.experimental.pallas import tpu as pltpu

_EPS = 1e-5  # torch default eps for InstanceNorm2d and BatchNorm2d


def _fused_kernel(x_ref, w1_ref, w2_ref,
                  wg_ref, bg_ref, wth_ref, bth_ref, wph_ref, bph_ref,
                  ww_ref, bw_ref, out_ref, *, H, W):
    """One batch element per grid step.

    x_ref  : (1, C, H*W)   lane-dense NCHW activations
    w1_ref : (C, 9*C)      conv1 weights packed [o, (kh*3+kw)*C + i]
    w2_ref : (C, 9*C)      conv2 weights (same packing)
    wg/wth/wph_ref : (Ci, C), bg/bth/bph_ref : (Ci, 1)   1x1 conv params
    ww_ref : (C, Ci), bw_ref : (C, 1)   BN-folded W-branch 1x1 conv
    out_ref: (1, C, H*W)
    """
    C = x_ref.shape[1]
    HW = H * W
    mm_dtype = w1_ref.dtype            # f32 or bf16 (set in the wrapper)
    f32 = jnp.float32

    xf = x_ref[0].astype(f32)                               # (C, HW)

    # Reflect-boundary masks depend only on lane position -> build at (1, HW)
    # and let jnp.where broadcast over sublanes (C). pos/col die right after.
    pos = jax.lax.broadcasted_iota(jnp.int32, (1, HW), 1)
    col = jnp.bitwise_and(pos, W - 1) if (W & (W - 1)) == 0 else pos % W
    top = pos < W
    bot = pos >= (H - 1) * W
    left = col == 0
    right = col == W - 1

    def lroll(a, shift):
        # XLU lane rotation; positive static shift (jnp.roll semantics).
        return pltpu.roll(a, shift % HW, 1)

    def tap_slab(a):
        """im2col: concat of the 9 reflect-padded shifted copies -> (9C, HW).

        Row block t = kh*3 + kw holds the tap at (h + kh - 1, w + kw - 1) with
        ReflectionPad2d(1) boundary handling. Rolls are deduplicated: one +-W
        pair per conv, one +-1 pair per row candidate (8 rotations total).
        """
        up = lroll(a, W)      # value from row h-1 (wraps at h==0, masked below)
        dn = lroll(a, -W)     # value from row h+1
        rows = (jnp.where(top, dn, up),        # dh = -1 (reflect at h==0)
                a,                             # dh =  0
                jnp.where(bot, up, dn))        # dh = +1 (reflect at h==H-1)
        taps = []
        for v in rows:
            lf = lroll(v, 1)     # value from col w-1
            rt = lroll(v, -1)    # value from col w+1
            taps.append(jnp.where(left, rt, lf))     # dw = -1 (reflect at w==0)
            taps.append(v)                           # dw =  0
            taps.append(jnp.where(right, lf, rt))    # dw = +1 (reflect at w==W-1)
        return jnp.concatenate(taps, axis=0)         # (9C, HW)

    def conv3x3_instnorm(a, w_ref):
        # reflect-pad(1) + 3x3 conv as ONE MXU matmul (bias dropped: cancelled
        # by InstanceNorm) + InstanceNorm2d(affine=False), f32 accumulation.
        slab = tap_slab(a).astype(mm_dtype)
        acc = jnp.dot(w_ref[...], slab, preferred_element_type=f32)   # (C, HW)
        mean = jnp.mean(acc, axis=1, keepdims=True)
        cen = acc - mean
        var = jnp.mean(cen * cen, axis=1, keepdims=True)
        return cen * jax.lax.rsqrt(var + _EPS)

    h1 = jnp.maximum(conv3x3_instnorm(xf, w1_ref), 0.0)
    h2 = conv3x3_instnorm(h1, w2_ref)
    r = xf + h2                                             # residual skip

    # ---- Non_local attention on r (1x1 convs are plain matmuls here) ----
    rm = r.astype(mm_dtype)
    g = jnp.dot(wg_ref[...], rm, preferred_element_type=f32) + bg_ref[...]
    th = jnp.dot(wth_ref[...], rm, preferred_element_type=f32) + bth_ref[...]
    ph = jnp.dot(wph_ref[...], rm, preferred_element_type=f32) + bph_ref[...]
    # Reassociated attention: y_perm = (1/HW) * (g @ phi^T) @ theta
    # (identical to permute((theta^T @ phi / HW) @ g^T); no HWxHW matrix).
    m = jax.lax.dot_general(g.astype(mm_dtype), ph.astype(mm_dtype),
                            (((1,), (1,)), ((), ())),
                            preferred_element_type=f32)     # (Ci, Ci)
    y = jnp.dot(m.astype(mm_dtype), th.astype(mm_dtype),
                preferred_element_type=f32) * (1.0 / HW)    # (Ci, HW)
    wy = jnp.dot(ww_ref[...], y.astype(mm_dtype),
                 preferred_element_type=f32) + bw_ref[...]  # (C, HW)
    out_ref[0] = (r + wy).astype(out_ref.dtype)


def residual_block_non_local(x, params, *, matmul_dtype=jnp.float32):
    """x: (N, C, H, W) float32.  Forward of ResidualBlock_Non_local.

    matmul_dtype: dtype of MXU operands. Use jnp.bfloat16 on v6e/v7x for the
    bf16-native MXU; accumulation and normalization stay float32.
    """
    N, C, H, W = x.shape
    assert H >= 2 and W >= 2, "reflect-pad shift trick needs H, W >= 2"
    HW = H * W
    Ci = params["w_theta"].shape[0]
    f32 = jnp.float32

    # Pre-pack weights (done once, outside the kernel).
    # Conv weights packed so w[o, (kh*3+kw)*C + i] matches the tap-slab rows.
    w1p = params["w1"].transpose(0, 2, 3, 1).reshape(C, 9 * C).astype(matmul_dtype)
    w2p = params["w2"].transpose(0, 2, 3, 1).reshape(C, 9 * C).astype(matmul_dtype)
    wg = params["w_g"].reshape(Ci, C).astype(matmul_dtype)
    wth = params["w_theta"].reshape(Ci, C).astype(matmul_dtype)
    wph = params["w_phi"].reshape(Ci, C).astype(matmul_dtype)
    bg = params["b_g"].reshape(Ci, 1).astype(f32)
    bth = params["b_theta"].reshape(Ci, 1).astype(f32)
    bph = params["b_phi"].reshape(Ci, 1).astype(f32)
    # Fold eval-mode BatchNorm2d into the W-branch 1x1 conv.
    # TODO(synk): training-mode BatchNorm (batch stats over N,H,W) is not
    # computed in-kernel; eval-mode running stats are folded here instead.
    scale = params["bn_gamma"] * jax.lax.rsqrt(params["bn_var"] + _EPS)
    ww = (params["w_W"].reshape(C, Ci) * scale[:, None]).astype(matmul_dtype)
    bw = ((params["b_W"] - params["bn_mean"]) * scale
          + params["bn_beta"]).reshape(C, 1).astype(f32)
    # NOTE: conv biases b1/b2 are intentionally NOT passed to the kernel:
    # InstanceNorm (affine=False) subtracts the per-channel mean, cancelling them.

    xf = x.reshape(N, C, HW)                                # lane-dense slab

    def const_spec(shape):
        return pl.BlockSpec(shape, lambda n, _r=len(shape): (0,) * _r)

    kernel = functools.partial(_fused_kernel, H=H, W=W)
    out_flat = pl.pallas_call(
        kernel,
        out_shape=jax.ShapeDtypeStruct((N, C, HW), x.dtype),
        grid=(N,),
        in_specs=[
            pl.BlockSpec((1, C, HW), lambda n: (n, 0, 0)),
            const_spec((C, 9 * C)), const_spec((C, 9 * C)),
            const_spec((Ci, C)), const_spec((Ci, 1)),
            const_spec((Ci, C)), const_spec((Ci, 1)),
            const_spec((Ci, C)), const_spec((Ci, 1)),
            const_spec((C, Ci)), const_spec((C, 1)),
        ],
        out_specs=pl.BlockSpec((1, C, HW), lambda n: (n, 0, 0)),
        compiler_params=pltpu.CompilerParams(
            dimension_semantics=("parallel",),   # shards across v7x's 2 TCs
            vmem_limit_bytes=64 * 1024 * 1024),  # above v5e's 16 MiB default
    )(xf, w1p, w2p, wg, bg, wth, bth, wph, bph, ww, bw)
    return out_flat.reshape(N, C, H, W)


# ---------------- pure-JAX reference (independent correctness check) ----------
def _instance_norm_ref(x):
    mean = x.mean(axis=(2, 3), keepdims=True)
    var = ((x - mean) ** 2).mean(axis=(2, 3), keepdims=True)
    return (x - mean) * jax.lax.rsqrt(var + _EPS)


def _conv3x3_reflect_ref(x, w, b):
    xp = jnp.pad(x, ((0, 0), (0, 0), (1, 1), (1, 1)), mode="reflect")
    y = jax.lax.conv_general_dilated(
        xp, w, window_strides=(1, 1), padding="VALID",
        dimension_numbers=("NCHW", "OIHW", "NCHW"),
        precision=jax.lax.Precision.HIGHEST)
    return y + b[None, :, None, None]


def residual_block_non_local_ref(x, params):
    h = jnp.maximum(_instance_norm_ref(
        _conv3x3_reflect_ref(x, params["w1"], params["b1"])), 0.0)
    h = _instance_norm_ref(_conv3x3_reflect_ref(h, params["w2"], params["b2"]))
    r = x + h

    N, C, H, W = x.shape
    HW = H * W
    Ci = params["w_theta"].shape[0]
    rf = r.reshape(N, C, HW)

    def conv1x1(w, b):
        return jnp.einsum("oc,ncp->nop", w.reshape(-1, C), rf) + b[None, :, None]

    g = conv1x1(params["w_g"], params["b_g"])               # (N, Ci, HW)
    th = conv1x1(params["w_theta"], params["b_theta"])
    ph = conv1x1(params["w_phi"], params["b_phi"])
    f = jnp.einsum("ncj,nck->njk", th, ph) / HW             # (N, HW, HW)
    y = jnp.einsum("njk,nck->ncj", f, g)                    # permuted y
    wy = jnp.einsum("oc,ncj->noj", params["w_W"].reshape(C, Ci), y)
    wy = wy + params["b_W"][None, :, None]
    scale = params["bn_gamma"] * jax.lax.rsqrt(params["bn_var"] + _EPS)
    wy = wy * scale[None, :, None] + (
        params["bn_beta"] - params["bn_mean"] * scale)[None, :, None]
    return (rf + wy).reshape(N, C, H, W)


if __name__ == "__main__":
    N, C, H, W = 2, 4, 16, 16
    Ci = C // 2
    keys = jax.random.split(jax.random.PRNGKey(0), 17)
    x = jax.random.normal(keys[0], (N, C, H, W), dtype=jnp.float32)
    params = {
        "w1": 0.1 * jax.random.normal(keys[1], (C, C, 3, 3), jnp.float32),
        "b1": 0.1 * jax.random.normal(keys[2], (C,), jnp.float32),
        "w2": 0.1 * jax.random.normal(keys[3], (C, C, 3, 3), jnp.float32),
        "b2": 0.1 * jax.random.normal(keys[4], (C,), jnp.float32),
        "w_g": 0.1 * jax.random.normal(keys[5], (Ci, C, 1, 1), jnp.float32),
        "b_g": 0.1 * jax.random.normal(keys[6], (Ci,), jnp.float32),
        "w_theta": 0.1 * jax.random.normal(keys[7], (Ci, C, 1, 1), jnp.float32),
        "b_theta": 0.1 * jax.random.normal(keys[8], (Ci,), jnp.float32),
        "w_phi": 0.1 * jax.random.normal(keys[9], (Ci, C, 1, 1), jnp.float32),
        "b_phi": 0.1 * jax.random.normal(keys[10], (Ci,), jnp.float32),
        "w_W": 0.1 * jax.random.normal(keys[11], (C, Ci, 1, 1), jnp.float32),
        "b_W": 0.1 * jax.random.normal(keys[12], (C,), jnp.float32),
        # PyTorch init zeroes BN gamma/beta (identity branch); use non-trivial
        # values here so the non-local path is actually exercised/tested.
        "bn_gamma": 0.5 * jax.random.normal(keys[13], (C,), jnp.float32),
        "bn_beta": 0.1 * jax.random.normal(keys[14], (C,), jnp.float32),
        "bn_mean": 0.1 * jax.random.normal(keys[15], (C,), jnp.float32),
        "bn_var": 0.5 + jnp.abs(jax.random.normal(keys[16], (C,), jnp.float32)),
    }

    ref = residual_block_non_local_ref(x, params)

    # f32 MXU operands (default; exact path for v5e).
    out = jax.jit(residual_block_non_local)(x, params)
    out = jax.block_until_ready(out)
    assert out.shape == (N, C, H, W)
    err_f32 = float(jnp.max(jnp.abs(out - ref)))
    assert jnp.allclose(out, ref, atol=2e-2, rtol=2e-2), f"f32 mismatch: {err_f32}"

    # bf16 MXU operands (recommended on v6e/v7x); f32 accumulation + norms.
    out_bf16 = jax.jit(functools.partial(
        residual_block_non_local, matmul_dtype=jnp.bfloat16))(x, params)
    out_bf16 = jax.block_until_ready(out_bf16)
    err_bf16 = float(jnp.max(jnp.abs(out_bf16 - ref)))
    assert jnp.allclose(out_bf16, ref, atol=6e-2, rtol=6e-2), \
        f"bf16 mismatch: {err_bf16}"

    print("KERNEL_OK")
</pallas_src>

<mosaic_0001>
module attributes {stable_mosaic.version = 11 : i64} {
  func.func @_fused_kernel(%arg0: i32, %arg1: memref<1x4x256xf32, #tpu.memory_space<vmem>>, %arg2: memref<4x36xf32, #tpu.memory_space<vmem>>, %arg3: memref<4x36xf32, #tpu.memory_space<vmem>>, %arg4: memref<2x4xf32, #tpu.memory_space<vmem>>, %arg5: memref<2x1xf32, #tpu.memory_space<vmem>>, %arg6: memref<2x4xf32, #tpu.memory_space<vmem>>, %arg7: memref<2x1xf32, #tpu.memory_space<vmem>>, %arg8: memref<2x4xf32, #tpu.memory_space<vmem>>, %arg9: memref<2x1xf32, #tpu.memory_space<vmem>>, %arg10: memref<4x2xf32, #tpu.memory_space<vmem>>, %arg11: memref<4x1xf32, #tpu.memory_space<vmem>>, %arg12: memref<1x4x256xf32, #tpu.memory_space<vmem>>) attributes {dimension_semantics = [#tpu.dimension_semantics<parallel>], iteration_bounds = array<i64: 2>, scalar_prefetch = 0 : i64, scratch_operands = 0 : i64, tpu.core_type = #tpu.core_type<tc>, window_params = [{transform_indices = @transform_0, window_bounds = array<i64: 1, 4, 256>}, {pipeline_mode = #tpu.pipeline_mode<synchronous>, transform_indices = @transform_1, window_bounds = array<i64: 4, 36>}, {pipeline_mode = #tpu.pipeline_mode<synchronous>, transform_indices = @transform_2, window_bounds = array<i64: 4, 36>}, {pipeline_mode = #tpu.pipeline_mode<synchronous>, transform_indices = @transform_3, window_bounds = array<i64: 2, 4>}, {pipeline_mode = #tpu.pipeline_mode<synchronous>, transform_indices = @transform_4, window_bounds = array<i64: 2, 1>}, {pipeline_mode = #tpu.pipeline_mode<synchronous>, transform_indices = @transform_5, window_bounds = array<i64: 2, 4>}, {pipeline_mode = #tpu.pipeline_mode<synchronous>, transform_indices = @transform_6, window_bounds = array<i64: 2, 1>}, {pipeline_mode = #tpu.pipeline_mode<synchronous>, transform_indices = @transform_7, window_bounds = array<i64: 2, 4>}, {pipeline_mode = #tpu.pipeline_mode<synchronous>, transform_indices = @transform_8, window_bounds = array<i64: 2, 1>}, {pipeline_mode = #tpu.pipeline_mode<synchronous>, transform_indices = @transform_9, window_bounds = array<i64: 4, 2>}, {pipeline_mode = #tpu.pipeline_mode<synchronous>, transform_indices = @transform_10, window_bounds = array<i64: 4, 1>}, {transform_indices = @transform_11, window_bounds = array<i64: 1, 4, 256>}]} {
    %c0 = arith.constant 0 : index
    %c0_0 = arith.constant 0 : index
    %c0_1 = arith.constant 0 : index
    %0 = vector.load %arg1[%c0, %c0_0, %c0_1] : memref<1x4x256xf32, #tpu.memory_space<vmem>>, vector<1x4x256xf32>
    %1 = vector.shape_cast %0 : vector<1x4x256xf32> to vector<4x256xf32>
    %2 = tpu.iota {dimensions = array<i32: 1>} : vector<1x256xi32>
    %c15_i32 = arith.constant 15 : i32
    %3 = vector.broadcast %c15_i32 : i32 to vector<1x256xi32>
    %4 = arith.andi %2, %3 : vector<1x256xi32>
    %c16_i32 = arith.constant 16 : i32
    %5 = vector.broadcast %c16_i32 : i32 to vector<1x256xi32>
    %6 = arith.cmpi slt, %2, %5 : vector<1x256xi32>
    %c240_i32 = arith.constant 240 : i32
    %7 = vector.broadcast %c240_i32 : i32 to vector<1x256xi32>
    %8 = arith.cmpi sge, %2, %7 : vector<1x256xi32>
    %c0_i32 = arith.constant 0 : i32
    %9 = vector.broadcast %c0_i32 : i32 to vector<1x256xi32>
    %10 = arith.cmpi eq, %4, %9 : vector<1x256xi32>
    %c15_i32_2 = arith.constant 15 : i32
    %11 = vector.broadcast %c15_i32_2 : i32 to vector<1x256xi32>
    %12 = arith.cmpi eq, %4, %11 : vector<1x256xi32>
    %c16_i32_3 = arith.constant 16 : i32
    %13 = tpu.dynamic_rotate %1 by %c16_i32_3 dim 1 : vector<4x256xf32>, i32 -> vector<4x256xf32>
    %c240_i32_4 = arith.constant 240 : i32
    %14 = tpu.dynamic_rotate %1 by %c240_i32_4 dim 1 : vector<4x256xf32>, i32 -> vector<4x256xf32>
    %15 = vector.shape_cast %6 : vector<1x256xi1> to vector<1x256xi1>
    %16 = vector.broadcast %15 : vector<1x256xi1> to vector<4x256xi1>
    %17 = arith.select %16, %14, %13 : vector<4x256xi1>, vector<4x256xf32>
    %18 = vector.shape_cast %8 : vector<1x256xi1> to vector<1x256xi1>
    %19 = vector.broadcast %18 : vector<1x256xi1> to vector<4x256xi1>
    %20 = arith.select %19, %13, %14 : vector<4x256xi1>, vector<4x256xf32>
    %c1_i32 = arith.constant 1 : i32
    %21 = tpu.dynamic_rotate %17 by %c1_i32 dim 1 : vector<4x256xf32>, i32 -> vector<4x256xf32>
    %c255_i32 = arith.constant 255 : i32
    %22 = tpu.dynamic_rotate %17 by %c255_i32 dim 1 : vector<4x256xf32>, i32 -> vector<4x256xf32>
    %23 = vector.shape_cast %10 : vector<1x256xi1> to vector<1x256xi1>
    %24 = vector.broadcast %23 : vector<1x256xi1> to vector<4x256xi1>
    %25 = arith.select %24, %22, %21 : vector<4x256xi1>, vector<4x256xf32>
    %26 = vector.shape_cast %12 : vector<1x256xi1> to vector<1x256xi1>
    %27 = vector.broadcast %26 : vector<1x256xi1> to vector<4x256xi1>
    %28 = arith.select %27, %21, %22 : vector<4x256xi1>, vector<4x256xf32>
    %c1_i32_5 = arith.constant 1 : i32
    %29 = tpu.dynamic_rotate %1 by %c1_i32_5 dim 1 : vector<4x256xf32>, i32 -> vector<4x256xf32>
    %c255_i32_6 = arith.constant 255 : i32
    %30 = tpu.dynamic_rotate %1 by %c255_i32_6 dim 1 : vector<4x256xf32>, i32 -> vector<4x256xf32>
    %31 = vector.shape_cast %10 : vector<1x256xi1> to vector<1x256xi1>
    %32 = vector.broadcast %31 : vector<1x256xi1> to vector<4x256xi1>
    %33 = arith.select %32, %30, %29 : vector<4x256xi1>, vector<4x256xf32>
    %34 = vector.shape_cast %12 : vector<1x256xi1> to vector<1x256xi1>
    %35 = vector.broadcast %34 : vector<1x256xi1> to vector<4x256xi1>
    %36 = arith.select %35, %29, %30 : vector<4x256xi1>, vector<4x256xf32>
    %c1_i32_7 = arith.constant 1 : i32
    %37 = tpu.dynamic_rotate %20 by %c1_i32_7 dim 1 : vector<4x256xf32>, i32 -> vector<4x256xf32>
    %c255_i32_8 = arith.constant 255 : i32
    %38 = tpu.dynamic_rotate %20 by %c255_i32_8 dim 1 : vector<4x256xf32>, i32 -> vector<4x256xf32>
    %39 = vector.shape_cast %10 : vector<1x256xi1> to vector<1x256xi1>
    %40 = vector.broadcast %39 : vector<1x256xi1> to vector<4x256xi1>
    %41 = arith.select %40, %38, %37 : vector<4x256xi1>, vector<4x256xf32>
    %42 = vector.shape_cast %12 : vector<1x256xi1> to vector<1x256xi1>
    %43 = vector.broadcast %42 : vector<1x256xi1> to vector<4x256xi1>
    %44 = arith.select %43, %37, %38 : vector<4x256xi1>, vector<4x256xf32>
    %45 = tpu.concatenate %25, %17, %28, %33, %1, %36, %41, %20, %44 in 0 : vector<4x256xf32>, vector<4x256xf32>, vector<4x256xf32>, vector<4x256xf32>, vector<4x256xf32>, vector<4x256xf32>, vector<4x256xf32>, vector<4x256xf32>, vector<4x256xf32> -> vector<36x256xf32>
    %c0_9 = arith.constant 0 : index
    %c0_10 = arith.constant 0 : index
    %46 = vector.load %arg2[%c0_9, %c0_10] : memref<4x36xf32, #tpu.memory_space<vmem>>, vector<4x36xf32>
    %cst = arith.constant dense<0.000000e+00> : vector<4x256xf32>
    %47 = tpu.matmul %46, %45, %cst {dimension_numbers = #tpu.dot_dimension_numbers<[1], [0], [0], [1], [0, 0, 1, 1], [], []>} : vector<4x36xf32>, vector<36x256xf32>, vector<4x256xf32> -> vector<4x256xf32>
    %cst_11 = arith.constant dense<0.000000e+00> : vector<4xf32>
    %48 = vector.multi_reduction <add>, %47, %cst_11 [1] : vector<4x256xf32> to vector<4xf32>
    %49 = vector.shape_cast %48 : vector<4xf32> to vector<4x1xf32>
    %cst_12 = arith.constant 2.560000e+02 : f32
    %50 = vector.broadcast %cst_12 : f32 to vector<4x1xf32>
    %51 = arith.divf %49, %50 : vector<4x1xf32>
    %52 = vector.broadcast %51 : vector<4x1xf32> to vector<4x256xf32>
    %53 = arith.subf %47, %52 : vector<4x256xf32>
    %54 = arith.mulf %53, %53 : vector<4x256xf32>
    %cst_13 = arith.constant dense<0.000000e+00> : vector<4xf32>
    %55 = vector.multi_reduction <add>, %54, %cst_13 [1] : vector<4x256xf32> to vector<4xf32>
    %56 = vector.shape_cast %55 : vector<4xf32> to vector<4x1xf32>
    %cst_14 = arith.constant 2.560000e+02 : f32
    %57 = vector.broadcast %cst_14 : f32 to vector<4x1xf32>
    %58 = arith.divf %56, %57 : vector<4x1xf32>
    %cst_15 = arith.constant 9.99999974E-6 : f32
    %59 = vector.broadcast %cst_15 : f32 to vector<4x1xf32>
    %60 = arith.addf %58, %59 : vector<4x1xf32>
    %61 = math.rsqrt %60 : vector<4x1xf32>
    %62 = vector.broadcast %61 : vector<4x1xf32> to vector<4x256xf32>
    %63 = arith.mulf %53, %62 : vector<4x256xf32>
    %cst_16 = arith.constant 0.000000e+00 : f32
    %64 = vector.broadcast %cst_16 : f32 to vector<4x256xf32>
    %65 = arith.maximumf %63, %64 : vector<4x256xf32>
    %c16_i32_17 = arith.constant 16 : i32
    %66 = tpu.dynamic_rotate %65 by %c16_i32_17 dim 1 : vector<4x256xf32>, i32 -> vector<4x256xf32>
    %c240_i32_18 = arith.constant 240 : i32
    %67 = tpu.dynamic_rotate %65 by %c240_i32_18 dim 1 : vector<4x256xf32>, i32 -> vector<4x256xf32>
    %68 = vector.shape_cast %6 : vector<1x256xi1> to vector<1x256xi1>
    %69 = vector.broadcast %68 : vector<1x256xi1> to vector<4x256xi1>
    %70 = arith.select %69, %67, %66 : vector<4x256xi1>, vector<4x256xf32>
    %71 = vector.shape_cast %8 : vector<1x256xi1> to vector<1x256xi1>
    %72 = vector.broadcast %71 : vector<1x256xi1> to vector<4x256xi1>
    %73 = arith.select %72, %66, %67 : vector<4x256xi1>, vector<4x256xf32>
    %c1_i32_19 = arith.constant 1 : i32
    %74 = tpu.dynamic_rotate %70 by %c1_i32_19 dim 1 : vector<4x256xf32>, i32 -> vector<4x256xf32>
    %c255_i32_20 = arith.constant 255 : i32
    %75 = tpu.dynamic_rotate %70 by %c255_i32_20 dim 1 : vector<4x256xf32>, i32 -> vector<4x256xf32>
    %76 = vector.shape_cast %10 : vector<1x256xi1> to vector<1x256xi1>
    %77 = vector.broadcast %76 : vector<1x256xi1> to vector<4x256xi1>
    %78 = arith.select %77, %75, %74 : vector<4x256xi1>, vector<4x256xf32>
    %79 = vector.shape_cast %12 : vector<1x256xi1> to vector<1x256xi1>
    %80 = vector.broadcast %79 : vector<1x256xi1> to vector<4x256xi1>
    %81 = arith.select %80, %74, %75 : vector<4x256xi1>, vector<4x256xf32>
    %c1_i32_21 = arith.constant 1 : i32
    %82 = tpu.dynamic_rotate %65 by %c1_i32_21 dim 1 : vector<4x256xf32>, i32 -> vector<4x256xf32>
    %c255_i32_22 = arith.constant 255 : i32
    %83 = tpu.dynamic_rotate %65 by %c255_i32_22 dim 1 : vector<4x256xf32>, i32 -> vector<4x256xf32>
    %84 = vector.shape_cast %10 : vector<1x256xi1> to vector<1x256xi1>
    %85 = vector.broadcast %84 : vector<1x256xi1> to vector<4x256xi1>
    %86 = arith.select %85, %83, %82 : vector<4x256xi1>, vector<4x256xf32>
    %87 = vector.shape_cast %12 : vector<1x256xi1> to vector<1x256xi1>
    %88 = vector.broadcast %87 : vector<1x256xi1> to vector<4x256xi1>
    %89 = arith.select %88, %82, %83 : vector<4x256xi1>, vector<4x256xf32>
    %c1_i32_23 = arith.constant 1 : i32
    %90 = tpu.dynamic_rotate %73 by %c1_i32_23 dim 1 : vector<4x256xf32>, i32 -> vector<4x256xf32>
    %c255_i32_24 = arith.constant 255 : i32
    %91 = tpu.dynamic_rotate %73 by %c255_i32_24 dim 1 : vector<4x256xf32>, i32 -> vector<4x256xf32>
    %92 = vector.shape_cast %10 : vector<1x256xi1> to vector<1x256xi1>
    %93 = vector.broadcast %92 : vector<1x256xi1> to vector<4x256xi1>
    %94 = arith.select %93, %91, %90 : vector<4x256xi1>, vector<4x256xf32>
    %95 = vector.shape_cast %12 : vector<1x256xi1> to vector<1x256xi1>
    %96 = vector.broadcast %95 : vector<1x256xi1> to vector<4x256xi1>
    %97 = arith.select %96, %90, %91 : vector<4x256xi1>, vector<4x256xf32>
    %98 = tpu.concatenate %78, %70, %81, %86, %65, %89, %94, %73, %97 in 0 : vector<4x256xf32>, vector<4x256xf32>, vector<4x256xf32>, vector<4x256xf32>, vector<4x256xf32>, vector<4x256xf32>, vector<4x256xf32>, vector<4x256xf32>, vector<4x256xf32> -> vector<36x256xf32>
    %c0_25 = arith.constant 0 : index
    %c0_26 = arith.constant 0 : index
    %99 = vector.load %arg3[%c0_25, %c0_26] : memref<4x36xf32, #tpu.memory_space<vmem>>, vector<4x36xf32>
    %cst_27 = arith.constant dense<0.000000e+00> : vector<4x256xf32>
    %100 = tpu.matmul %99, %98, %cst_27 {dimension_numbers = #tpu.dot_dimension_numbers<[1], [0], [0], [1], [0, 0, 1, 1], [], []>} : vector<4x36xf32>, vector<36x256xf32>, vector<4x256xf32> -> vector<4x256xf32>
    %cst_28 = arith.constant dense<0.000000e+00> : vector<4xf32>
    %101 = vector.multi_reduction <add>, %100, %cst_28 [1] : vector<4x256xf32> to vector<4xf32>
    %102 = vector.shape_cast %101 : vector<4xf32> to vector<4x1xf32>
    %cst_29 = arith.constant 2.560000e+02 : f32
    %103 = vector.broadcast %cst_29 : f32 to vector<4x1xf32>
    %104 = arith.divf %102, %103 : vector<4x1xf32>
    %105 = vector.broadcast %104 : vector<4x1xf32> to vector<4x256xf32>
    %106 = arith.subf %100, %105 : vector<4x256xf32>
    %107 = arith.mulf %106, %106 : vector<4x256xf32>
    %cst_30 = arith.constant dense<0.000000e+00> : vector<4xf32>
    %108 = vector.multi_reduction <add>, %107, %cst_30 [1] : vector<4x256xf32> to vector<4xf32>
    %109 = vector.shape_cast %108 : vector<4xf32> to vector<4x1xf32>
    %cst_31 = arith.constant 2.560000e+02 : f32
    %110 = vector.broadcast %cst_31 : f32 to vector<4x1xf32>
    %111 = arith.divf %109, %110 : vector<4x1xf32>
    %cst_32 = arith.constant 9.99999974E-6 : f32
    %112 = vector.broadcast %cst_32 : f32 to vector<4x1xf32>
    %113 = arith.addf %111, %112 : vector<4x1xf32>
    %114 = math.rsqrt %113 : vector<4x1xf32>
    %115 = vector.broadcast %114 : vector<4x1xf32> to vector<4x256xf32>
    %116 = arith.mulf %106, %115 : vector<4x256xf32>
    %117 = arith.addf %1, %116 : vector<4x256xf32>
    %c0_33 = arith.constant 0 : index
    %c0_34 = arith.constant 0 : index
    %118 = vector.load %arg4[%c0_33, %c0_34] : memref<2x4xf32, #tpu.memory_space<vmem>>, vector<2x4xf32>
    %cst_35 = arith.constant dense<0.000000e+00> : vector<2x256xf32>
    %119 = tpu.matmul %118, %117, %cst_35 {dimension_numbers = #tpu.dot_dimension_numbers<[1], [0], [0], [1], [0, 0, 1, 1], [], []>} : vector<2x4xf32>, vector<4x256xf32>, vector<2x256xf32> -> vector<2x256xf32>
    %c0_36 = arith.constant 0 : index
    %c0_37 = arith.constant 0 : index
    %120 = vector.load %arg5[%c0_36, %c0_37] : memref<2x1xf32, #tpu.memory_space<vmem>>, vector<2x1xf32>
    %121 = vector.broadcast %120 : vector<2x1xf32> to vector<2x256xf32>
    %122 = arith.addf %119, %121 : vector<2x256xf32>
    %c0_38 = arith.constant 0 : index
    %c0_39 = arith.constant 0 : index
    %123 = vector.load %arg6[%c0_38, %c0_39] : memref<2x4xf32, #tpu.memory_space<vmem>>, vector<2x4xf32>
    %cst_40 = arith.constant dense<0.000000e+00> : vector<2x256xf32>
    %124 = tpu.matmul %123, %117, %cst_40 {dimension_numbers = #tpu.dot_dimension_numbers<[1], [0], [0], [1], [0, 0, 1, 1], [], []>} : vector<2x4xf32>, vector<4x256xf32>, vector<2x256xf32> -> vector<2x256xf32>
    %c0_41 = arith.constant 0 : index
    %c0_42 = arith.constant 0 : index
    %125 = vector.load %arg7[%c0_41, %c0_42] : memref<2x1xf32, #tpu.memory_space<vmem>>, vector<2x1xf32>
    %126 = vector.broadcast %125 : vector<2x1xf32> to vector<2x256xf32>
    %127 = arith.addf %124, %126 : vector<2x256xf32>
    %c0_43 = arith.constant 0 : index
    %c0_44 = arith.constant 0 : index
    %128 = vector.load %arg8[%c0_43, %c0_44] : memref<2x4xf32, #tpu.memory_space<vmem>>, vector<2x4xf32>
    %cst_45 = arith.constant dense<0.000000e+00> : vector<2x256xf32>
    %129 = tpu.matmul %128, %117, %cst_45 {dimension_numbers = #tpu.dot_dimension_numbers<[1], [0], [0], [1], [0, 0, 1, 1], [], []>} : vector<2x4xf32>, vector<4x256xf32>, vector<2x256xf32> -> vector<2x256xf32>
    %c0_46 = arith.constant 0 : index
    %c0_47 = arith.constant 0 : index
    %130 = vector.load %arg9[%c0_46, %c0_47] : memref<2x1xf32, #tpu.memory_space<vmem>>, vector<2x1xf32>
    %131 = vector.broadcast %130 : vector<2x1xf32> to vector<2x256xf32>
    %132 = arith.addf %129, %131 : vector<2x256xf32>
    %cst_48 = arith.constant dense<0.000000e+00> : vector<2x2xf32>
    %133 = tpu.matmul %122, %132, %cst_48 {dimension_numbers = #tpu.dot_dimension_numbers<[1], [1], [0], [0], [0, 0, 1, 0], [], []>} : vector<2x256xf32>, vector<2x256xf32>, vector<2x2xf32> -> vector<2x2xf32>
    %cst_49 = arith.constant dense<0.000000e+00> : vector<2x256xf32>
    %134 = tpu.matmul %133, %127, %cst_49 {dimension_numbers = #tpu.dot_dimension_numbers<[1], [0], [0], [1], [0, 0, 1, 1], [], []>} : vector<2x2xf32>, vector<2x256xf32>, vector<2x256xf32> -> vector<2x256xf32>
    %cst_50 = arith.constant 3.906250e-03 : f32
    %135 = vector.broadcast %cst_50 : f32 to vector<2x256xf32>
    %136 = arith.mulf %134, %135 : vector<2x256xf32>
    %c0_51 = arith.constant 0 : index
    %c0_52 = arith.constant 0 : index
    %137 = vector.load %arg10[%c0_51, %c0_52] : memref<4x2xf32, #tpu.memory_space<vmem>>, vector<4x2xf32>
    %cst_53 = arith.constant dense<0.000000e+00> : vector<4x256xf32>
    %138 = tpu.matmul %137, %136, %cst_53 {dimension_numbers = #tpu.dot_dimension_numbers<[1], [0], [0], [1], [0, 0, 1, 1], [], []>} : vector<4x2xf32>, vector<2x256xf32>, vector<4x256xf32> -> vector<4x256xf32>
    %c0_54 = arith.constant 0 : index
    %c0_55 = arith.constant 0 : index
    %139 = vector.load %arg11[%c0_54, %c0_55] : memref<4x1xf32, #tpu.memory_space<vmem>>, vector<4x1xf32>
    %140 = vector.broadcast %139 : vector<4x1xf32> to vector<4x256xf32>
    %141 = arith.addf %138, %140 : vector<4x256xf32>
    %142 = arith.addf %117, %141 : vector<4x256xf32>
    %c0_56 = arith.constant 0 : index
    %c0_57 = arith.constant 0 : index
    %c0_58 = arith.constant 0 : index
    %143 = vector.load %arg12[%c0_56, %c0_57, %c0_58] : memref<1x4x256xf32, #tpu.memory_space<vmem>>, vector<1x4x256xf32>
    %144 = vector.shape_cast %143 : vector<1x4x256xf32> to vector<4x256xf32>
    %145 = vector.shape_cast %142 : vector<4x256xf32> to vector<1x4x256xf32>
    tpu.vector_store %arg12[%c0_56, %c0_57, %c0_58], %145 {strides = array<i32>} : memref<1x4x256xf32, #tpu.memory_space<vmem>>, vector<1x4x256xf32>,
    return
  }
  func.func @transform_0(%arg0: i32) -> (i32, i32, i32) {
    %c0_i32 = arith.constant 0 : i32
    %c0_i32_0 = arith.constant 0 : i32
    %c0_i32_1 = arith.constant 0 : i32
    return %arg0, %c0_i32, %c0_i32_0 : i32, i32, i32
  }
  func.func @transform_1(%arg0: i32) -> (i32, i32) {
    %c0_i32 = arith.constant 0 : i32
    %c0_i32_0 = arith.constant 0 : i32
    %c0_i32_1 = arith.constant 0 : i32
    return %c0_i32, %c0_i32_0 : i32, i32
  }
  func.func @transform_2(%arg0: i32) -> (i32, i32) {
    %c0_i32 = arith.constant 0 : i32
    %c0_i32_0 = arith.constant 0 : i32
    %c0_i32_1 = arith.constant 0 : i32
    return %c0_i32, %c0_i32_0 : i32, i32
  }
  func.func @transform_3(%arg0: i32) -> (i32, i32) {
    %c0_i32 = arith.constant 0 : i32
    %c0_i32_0 = arith.constant 0 : i32
    %c0_i32_1 = arith.constant 0 : i32
    return %c0_i32, %c0_i32_0 : i32, i32
  }
  func.func @transform_4(%arg0: i32) -> (i32, i32) {
    %c0_i32 = arith.constant 0 : i32
    %c0_i32_0 = arith.constant 0 : i32
    %c0_i32_1 = arith.constant 0 : i32
    return %c0_i32, %c0_i32_0 : i32, i32
  }
  func.func @transform_5(%arg0: i32) -> (i32, i32) {
    %c0_i32 = arith.constant 0 : i32
    %c0_i32_0 = arith.constant 0 : i32
    %c0_i32_1 = arith.constant 0 : i32
    return %c0_i32, %c0_i32_0 : i32, i32
  }
  func.func @transform_6(%arg0: i32) -> (i32, i32) {
    %c0_i32 = arith.constant 0 : i32
    %c0_i32_0 = arith.constant 0 : i32
    %c0_i32_1 = arith.constant 0 : i32
    return %c0_i32, %c0_i32_0 : i32, i32
  }
  func.func @transform_7(%arg0: i32) -> (i32, i32) {
    %c0_i32 = arith.constant 0 : i32
    %c0_i32_0 = arith.constant 0 : i32
    %c0_i32_1 = arith.constant 0 : i32
    return %c0_i32, %c0_i32_0 : i32, i32
  }
  func.func @transform_8(%arg0: i32) -> (i32, i32) {
    %c0_i32 = arith.constant 0 : i32
    %c0_i32_0 = arith.constant 0 : i32
    %c0_i32_1 = arith.constant 0 : i32
    return %c0_i32, %c0_i32_0 : i32, i32
  }
  func.func @transform_9(%arg0: i32) -> (i32, i32) {
    %c0_i32 = arith.constant 0 : i32
    %c0_i32_0 = arith.constant 0 : i32
    %c0_i32_1 = arith.constant 0 : i32
    return %c0_i32, %c0_i32_0 : i32, i32
  }
  func.func @transform_10(%arg0: i32) -> (i32, i32) {
    %c0_i32 = arith.constant 0 : i32
    %c0_i32_0 = arith.constant 0 : i32
    %c0_i32_1 = arith.constant 0 : i32
    return %c0_i32, %c0_i32_0 : i32, i32
  }
  func.func @transform_11(%arg0: i32) -> (i32, i32, i32) {
    %c0_i32 = arith.constant 0 : i32
    %c0_i32_0 = arith.constant 0 : i32
    %c0_i32_1 = arith.constant 0 : i32
    return %arg0, %c0_i32, %c0_i32_0 : i32, i32, i32
  }
}

</mosaic_0001>

<bundles_post_ra>
// kernel: residual_block_non_local.1
= control target key start
LH: loop header
LB: loop body
LE: loop exit
PB: predicated region body
PF: predicated region fallthrough
CT: control target
= control target key end

     0   :  { %s3068_s0 = inlined_call_operand.hbm [shape: f32[2,4,256], index: 0, kind: input, shape index: {}]   ;;  %s3069_s1 = inlined_call_operand.hbm [shape: f32[4,36], index: 1, kind: input, shape index: {}]   ;;  %s3070_s2 = inlined_call_operand.hbm [shape: f32[4,36], index: 2, kind: input, shape index: {}]   ;;  %s3071_s3 = inlined_call_operand.hbm [shape: f32[2,4], index: 3, kind: input, shape index: {}]   ;;  %s3072_s4 = inlined_call_operand.hbm [shape: f32[2,1], index: 4, kind: input, shape index: {}]   ;;  %s3073_s5 = inlined_call_operand.hbm [shape: f32[2,4], index: 5, kind: input, shape index: {}]   ;;  %s3074_s6 = inlined_call_operand.hbm [shape: f32[2,1], index: 6, kind: input, shape index: {}]   ;;  %s3075_s7 = inlined_call_operand.hbm [shape: f32[2,4], index: 7, kind: input, shape index: {}]   ;;  %s3076_s8 = inlined_call_operand.hbm [shape: f32[2,1], index: 8, kind: input, shape index: {}]   ;;  %s3077_s9 = inlined_call_operand.hbm [shape: f32[4,2], index: 9, kind: input, shape index: {}]   ;;  %s3078_s10 = inlined_call_operand.hbm [shape: f32[4,1], index: 10, kind: input, shape index: {}]   ;;  %s3079_s11 = inlined_call_operand.hbm [shape: f32[2,4,256], index: 11, kind: output, shape index: {}]  }
   0x1   :  { %3085 = sst [smem:[#allocation29_spill]] %s3069_s1 }
   0x2   :  { %3086 = sst [smem:[#allocation30_spill]] %s3070_s2 }
   0x3   :  { %3087 = sst [smem:[#allocation31_spill]] %s3079_s11 }
   0x4   :  { %16 = vsyncpa [#allocation3], 0 }
   0x5   :  { %18 = vsyncpa [#allocation3 + $0x1], 0 }
   0x6   :  { %19 = vsyncpa [#allocation6], 0 }
   0x7   :  { %20 = vsyncpa [#allocation9], 0 }
   0x8   :  { %21 = vsyncpa [#allocation12], 0 }
   0x9   :  { %22 = vsyncpa [#allocation15], 0 }
   0xa   :  { %23 = vsyncpa [#allocation18], 0 }
   0xb   :  { %24 = vsyncpa [#allocation4], 0 }
   0xc   :  { %26 = vsyncpa [#allocation4 + $0x1], 0  ;;  %s2394_s17 = smov 0   ;;  %s2396_s18 = smov 0  }
   0xd   :  { %s2398_s19 = smov 0   ;;  %s2400_s20 = smov 0  }
   0xe LB: > { %s2316_s21 = smov [#allocation5]   ;;  %s2415_s23 = sadd.s32 4294967295, %s2314_s20   ;;  %s2314_s20 = sphi %s2400_s20, %s3127_s20   ;;  %s2310_s19 = sphi %s2398_s19, %s3126_s19   ;;  %s2306_s18 = sphi %s2396_s18, %s3125_s18   ;;  %s2302_s17 = sphi %s2394_s17, %s3124_s17  }
   0xf   : > { %s312_s22 = sshll.u32 %s2316_s21, 4  ;;  %p1646_p0 = scmp.ge.s32.totalorder %s2314_s20, 1  ;;  %s2420_s22 = int_to_ptr.vmem [resolvable:$true] %s312_s22 }
  0x10   : > { %p3082_p1 = scmp.eq.s32.totalorder %s2415_s23, 0  ;;  %p299_p2 = scmp.lt.s32.totalorder %s2314_s20, 3 }
  0x11   : > { %s2317_s25 = smov [#allocation8]   ;;  %s2318_s27 = smov [#allocation11]  }
  0x12   : > { %p2422_p3 = pnand %p1646_p0, %p299_p2  ;;  %s334_s26 = sshll.u32 %s2317_s25, 4  ;;  %s2429_s26 = int_to_ptr.vmem [resolvable:$true] %s334_s26 }
  0x13   : > { %s356_s28 = sshll.u32 %s2318_s27, 4  ;;  %s2319_s30 = smov [#allocation14]   ;;  %s2437_s28 = int_to_ptr.vmem [resolvable:$true] %s356_s28 }
  0x14   : > { %s3088_s24 = scalar_select %p2422_p3, 1, 0 }
  0x15   : > { %p1762_p5 = pneg %p2422_p3  ;;  %s2439_s12 = sshll.u32 %s2319_s30, 4  ;;  %s379_s12 = int_to_ptr.vmem [resolvable:$true] %s2439_s12 }
  0x16   : > { %3089 = sst [smem:[#allocation28_spill]] %s3088_s24  ;;  %s3091_s1 = sld [smem:[#allocation29_spill]] }
  0x17   : > { %p2433_p6 = pnand %p1762_p5, %p3082_p1 }
  0x19   : > { %p2449_p8 = pneg %p2433_p6 }
  0x1c   : > { %s1918_s15 = scalar_lea.hbm %s3091_s1, 64 }
  0x1d   : > { %p1919_p7 = scmp.ne.s32.totalorder %s3091_s1, %s1918_s15  ;;  %p1925_p11 = scmp.lt.u32.totalorder %s1918_s15, %s3091_s1 }
  0x1f   : > { %p1921_p9 = pnand %p2449_p8, %p1919_p7 }
  0x21   : > { %p1922_p10 = pneg %p1921_p9 }
  0x23   : > { %p1927_p12 = pnand %p1925_p11, %p1922_p10 }
  0x25   : > { %1930 = shalt.err (!%p1927_p12)
}
  0x26   : > { %s1931_s13 = scalar_lea.vmem %s2420_s22, 64  ;;  %p1939_p5 = scmp.lt.s32.totalorder %s2420_s22, %s2420_s22 }
  0x27   : > { %p1932_p13 = scmp.ne.s32.totalorder %s2420_s22, %s1931_s13  ;;  %p1940_p4 = scmp.lt.s32.totalorder %s1931_s13, %s1931_s13 }
  0x29   : > { %p1934_p0 = pnand %p1932_p13, %p2449_p8  ;;  %p1941_p7 = por %p1940_p4, %p1939_p5 }
  0x2b   : > { %p1935_p2 = pneg %p1934_p0 }
  0x2d   : > { %p1942_p9 = pnand %p1941_p7, %p1935_p2 }
  0x2f   : > { %1945 = shalt.err (!%p1942_p9)
}
  0x30   : > { %1765 = dma.hbm_to_vmem [thread:$0]  (!%p2433_p6), %s3091_s1, 64, %s2420_s22, [#allocation6]  }
  0x31   : > { %s1946_s27 = scalar_lea.hbm %s3071_s3, 32 }
  0x32   : > { %p1947_p10 = scmp.ne.s32.totalorder %s3071_s3, %s1946_s27  ;;  %p1953_p12 = scmp.lt.u32.totalorder %s1946_s27, %s3071_s3 }
  0x34   : > { %p1949_p4 = pnand %p1947_p10, %p2449_p8 }
  0x36   : > { %p1950_p11 = pneg %p1949_p4 }
  0x38   : > { %p1955_p13 = pnand %p1953_p12, %p1950_p11 }
  0x3a   : > { %1958 = shalt.err (!%p1955_p13)
}
  0x3b   : > { %s1959_s22 = scalar_lea.vmem %s2429_s26, 32  ;;  %p1967_p7 = scmp.lt.s32.totalorder %s2429_s26, %s2429_s26 }
  0x3c   : > { %p1960_p0 = scmp.ne.s32.totalorder %s2429_s26, %s1959_s22  ;;  %p1968_p9 = scmp.lt.s32.totalorder %s1959_s22, %s1959_s22 }
  0x3e   : > { %p1962_p2 = pnand %p1960_p0, %p2449_p8  ;;  %p1969_p10 = por %p1968_p9, %p1967_p7 }
  0x40   : > { %p1963_p5 = pneg %p1962_p2 }
  0x42   : > { %p1970_p4 = pnand %p1969_p10, %p1963_p5 }
  0x44   : > { %1973 = shalt.err (!%p1970_p4)
}
  0x45   : > { %1771 = dma.hbm_to_vmem [thread:$0]  (!%p2433_p6), %s3071_s3, 32, %s2429_s26, [#allocation9]  }
  0x46   : > { %s1974_s16 = scalar_lea.hbm %s3073_s5, 32 }
  0x47   : > { %p1975_p11 = scmp.ne.s32.totalorder %s3073_s5, %s1974_s16  ;;  %p1981_p0 = scmp.lt.u32.totalorder %s1974_s16, %s3073_s5 }
  0x49   : > { %p1977_p12 = pnand %p1975_p11, %p2449_p8 }
  0x4b   : > { %p1978_p13 = pneg %p1977_p12 }
  0x4d   : > { %p1983_p2 = pnand %p1981_p0, %p1978_p13 }
  0x4f   : > { %1986 = shalt.err (!%p1983_p2)
}
  0x50   : > { %s1987_s26 = scalar_lea.vmem %s2437_s28, 32  ;;  %p1995_p10 = scmp.lt.s32.totalorder %s2437_s28, %s2437_s28 }
  0x51   : > { %p1988_p5 = scmp.ne.s32.totalorder %s2437_s28, %s1987_s26  ;;  %p1996_p4 = scmp.lt.s32.totalorder %s1987_s26, %s1987_s26 }
  0x53   : > { %p1990_p7 = pnand %p1988_p5, %p2449_p8  ;;  %p1997_p11 = por %p1996_p4, %p1995_p10 }
  0x55   : > { %p1991_p9 = pneg %p1990_p7 }
  0x57   : > { %p1998_p12 = pnand %p1997_p11, %p1991_p9 }
  0x59   : > { %2001 = shalt.err (!%p1998_p12)
}
  0x5a   : > { %1777 = dma.hbm_to_vmem [thread:$0]  (!%p2433_p6), %s3073_s5, 32, %s2437_s28, [#allocation12]  }
  0x5b   : > { %s2320_s24 = smov [#allocation17]   ;;  %s2002_s21 = scalar_lea.hbm %s3075_s7, 32 }
  0x5c   : > { %s400_s14 = sshll.u32 %s2320_s24, 4  ;;  %p2003_p13 = scmp.ne.s32.totalorder %s3075_s7, %s2002_s21  ;;  %s401_s14 = int_to_ptr.vmem [resolvable:$true] %s400_s14 }
  0x5d   : > { %p2009_p5 = scmp.lt.u32.totalorder %s2002_s21, %s3075_s7 }
  0x5e   : > { %p2005_p0 = pnand %p2003_p13, %p2449_p8 }
  0x60   : > { %p2006_p2 = pneg %p2005_p0 }
  0x62   : > { %p2011_p7 = pnand %p2009_p5, %p2006_p2 }
  0x64   : > { %2014 = shalt.err (!%p2011_p7)
}
  0x65   : > { %s2015_s28 = scalar_lea.vmem %s379_s12, 32  ;;  %p2023_p11 = scmp.lt.s32.totalorder %s379_s12, %s379_s12 }
  0x66   : > { %p2016_p9 = scmp.ne.s32.totalorder %s379_s12, %s2015_s28  ;;  %p2024_p12 = scmp.lt.s32.totalorder %s2015_s28, %s2015_s28 }
  0x68   : > { %p2018_p10 = pnand %p2016_p9, %p2449_p8  ;;  %p2025_p1 = por %p2024_p12, %p2023_p11 }
  0x6a   : > { %p2019_p4 = pneg %p2018_p10 }
  0x6c   : > { %p2026_p3 = pnand %p2025_p1, %p2019_p4 }
  0x6e   : > { %2029 = shalt.err (!%p2026_p3)
}
  0x6f   : > { %1783 = dma.hbm_to_vmem [thread:$0]  (!%p2433_p6), %s3075_s7, 32, %s379_s12, [#allocation15]  }
  0x70   : > { %s2030_s16 = scalar_lea.hbm %s3077_s9, 64 }
  0x71   : > { %p2031_p13 = scmp.ne.s32.totalorder %s3077_s9, %s2030_s16  ;;  %p2037_p3 = scmp.lt.u32.totalorder %s2030_s16, %s3077_s9 }
  0x73   : > { %p2033_p0 = pnand %p2031_p13, %p2449_p8 }
  0x75   : > { %p2034_p1 = pneg %p2033_p0 }
  0x77   : > { %p2039_p2 = pnand %p2037_p3, %p2034_p1 }
  0x79   : > { %2042 = shalt.err (!%p2039_p2)
}
  0x7a   : > { %s2043_s26 = scalar_lea.vmem %s401_s14, 64  ;;  %p2051_p10 = scmp.lt.s32.totalorder %s401_s14, %s401_s14 }
  0x7b   : > { %p2044_p5 = scmp.ne.s32.totalorder %s401_s14, %s2043_s26  ;;  %p2052_p4 = scmp.lt.s32.totalorder %s2043_s26, %s2043_s26 }
  0x7d   : > { %p2046_p7 = pnand %p2044_p5, %p2449_p8  ;;  %p2053_p11 = por %p2052_p4, %p2051_p10 }
  0x7f   : > { %p2047_p9 = pneg %p2046_p7 }
  0x81   : > { %p2054_p12 = pnand %p2053_p11, %p2047_p9 }
  0x83   : > { %2057 = shalt.err (!%p2054_p12)
}
  0x84   : > { %1789 = dma.hbm_to_vmem [thread:$0]  (!%p2433_p6), %s3077_s9, 64, %s401_s14, [#allocation18]  }
  0x85   : > { %s2321_s22 = smov [#allocation7]   ;;  %s2322_s24 = smov [#allocation10]  }
  0x86   : > { %s323_s11 = sshll.u32 %s2321_s22, 4  ;;  %s345_s15 = sshll.u32 %s2322_s24, 4  ;;  %s324_s11 = int_to_ptr.vmem [resolvable:$true] %s323_s11  ;;  %s346_s15 = int_to_ptr.vmem [resolvable:$true] %s345_s15 }
  0x87   : > { %s3093_s2 = sld [smem:[#allocation30_spill]] }
  0x8d   : > { %s2058_s27 = scalar_lea.hbm %s3093_s2, 64 }
  0x8e   : > { %p2059_p13 = scmp.ne.s32.totalorder %s3093_s2, %s2058_s27  ;;  %p2065_p3 = scmp.lt.u32.totalorder %s2058_s27, %s3093_s2 }
  0x90   : > { %p2061_p0 = pnand %p2059_p13, %p2449_p8 }
  0x92   : > { %p2062_p1 = pneg %p2061_p0 }
  0x94   : > { %p2067_p2 = pnand %p2065_p3, %p2062_p1 }
  0x96   : > { %2070 = shalt.err (!%p2067_p2)
}
  0x97   : > { %s2071_s14 = scalar_lea.vmem %s324_s11, 64  ;;  %p2079_p10 = scmp.lt.s32.totalorder %s324_s11, %s324_s11 }
  0x98   : > { %p2072_p5 = scmp.ne.s32.totalorder %s324_s11, %s2071_s14  ;;  %p2080_p4 = scmp.lt.s32.totalorder %s2071_s14, %s2071_s14 }
  0x9a   : > { %p2074_p7 = pnand %p2072_p5, %p2449_p8  ;;  %p2081_p11 = por %p2080_p4, %p2079_p10 }
  0x9c   : > { %p2075_p9 = pneg %p2074_p7 }
  0x9e   : > { %p2082_p12 = pnand %p2081_p11, %p2075_p9 }
  0xa0   : > { %2085 = shalt.err (!%p2082_p12)
}
  0xa1   : > { %1768 = dma.hbm_to_vmem [thread:$0]  (!%p2433_p6), %s3093_s2, 64, %s324_s11, [#allocation6]  }
  0xa2   : > { %s2086_s21 = scalar_lea.hbm %s3072_s4, 32 }
  0xa3   : > { %p2087_p13 = scmp.ne.s32.totalorder %s3072_s4, %s2086_s21  ;;  %p2093_p3 = scmp.lt.u32.totalorder %s2086_s21, %s3072_s4 }
  0xa5   : > { %p2089_p0 = pnand %p2087_p13, %p2449_p8 }
  0xa7   : > { %p2090_p1 = pneg %p2089_p0 }
  0xa9   : > { %p2095_p2 = pnand %p2093_p3, %p2090_p1 }
  0xab   : > { %2098 = shalt.err (!%p2095_p2)
}
  0xac   : > { %s2099_s12 = scalar_lea.vmem %s346_s15, 32  ;;  %p2107_p10 = scmp.lt.s32.totalorder %s346_s15, %s346_s15 }
  0xad   : > { %p2100_p5 = scmp.ne.s32.totalorder %s346_s15, %s2099_s12  ;;  %p2108_p4 = scmp.lt.s32.totalorder %s2099_s12, %s2099_s12 }
  0xaf   : > { %p2102_p7 = pnand %p2100_p5, %p2449_p8  ;;  %p2109_p11 = por %p2108_p4, %p2107_p10 }
  0xb1   : > { %p2103_p9 = pneg %p2102_p7 }
  0xb3   : > { %p2110_p12 = pnand %p2109_p11, %p2103_p9 }
  0xb5   : > { %2113 = shalt.err (!%p2110_p12)
}
  0xb6   : > { %1774 = dma.hbm_to_vmem [thread:$0]  (!%p2433_p6), %s3072_s4, 32, %s346_s15, [#allocation9]  }
  0xb7   : > { %s2323_s28 = smov [#allocation13]   ;;  %s2324_s24 = smov [#allocation16]  }
  0xb8   : > { %s367_s22 = sshll.u32 %s2323_s28, 4  ;;  %s389_s16 = sshll.u32 %s2324_s24, 4  ;;  %s368_s22 = int_to_ptr.vmem [resolvable:$true] %s367_s22  ;;  %s390_s16 = int_to_ptr.vmem [resolvable:$true] %s389_s16 }
  0xb9   : > { %s2114_s30 = scalar_lea.hbm %s3074_s6, 32 }
  0xba   : > { %p2115_p13 = scmp.ne.s32.totalorder %s3074_s6, %s2114_s30  ;;  %p2121_p3 = scmp.lt.u32.totalorder %s2114_s30, %s3074_s6 }
  0xbc   : > { %p2117_p0 = pnand %p2115_p13, %p2449_p8 }
  0xbe   : > { %p2118_p1 = pneg %p2117_p0 }
  0xc0   : > { %p2123_p2 = pnand %p2121_p3, %p2118_p1 }
  0xc2   : > { %2126 = shalt.err (!%p2123_p2)
}
  0xc3   : > { %s2127_s15 = scalar_lea.vmem %s368_s22, 32  ;;  %p2135_p10 = scmp.lt.s32.totalorder %s368_s22, %s368_s22 }
  0xc4   : > { %p2128_p5 = scmp.ne.s32.totalorder %s368_s22, %s2127_s15  ;;  %p2136_p4 = scmp.lt.s32.totalorder %s2127_s15, %s2127_s15 }
  0xc6   : > { %p2130_p7 = pnand %p2128_p5, %p2449_p8  ;;  %p2137_p11 = por %p2136_p4, %p2135_p10 }
  0xc8   : > { %p2131_p9 = pneg %p2130_p7 }
  0xca   : > { %p2138_p12 = pnand %p2137_p11, %p2131_p9 }
  0xcc   : > { %2141 = shalt.err (!%p2138_p12)
}
  0xcd   : > { %1780 = dma.hbm_to_vmem [thread:$0]  (!%p2433_p6), %s3074_s6, 32, %s368_s22, [#allocation12]  }
  0xce   : > { %s2142_s27 = scalar_lea.hbm %s3076_s8, 32 }
  0xcf   : > { %p2143_p13 = scmp.ne.s32.totalorder %s3076_s8, %s2142_s27  ;;  %p2149_p3 = scmp.lt.u32.totalorder %s2142_s27, %s3076_s8 }
  0xd1   : > { %p2145_p0 = pnand %p2143_p13, %p2449_p8 }
  0xd3   : > { %p2146_p1 = pneg %p2145_p0 }
  0xd5   : > { %p2151_p2 = pnand %p2149_p3, %p2146_p1 }
  0xd7   : > { %2154 = shalt.err (!%p2151_p2)
}
  0xd8   : > { %s2155_s11 = scalar_lea.vmem %s390_s16, 32  ;;  %p2163_p10 = scmp.lt.s32.totalorder %s390_s16, %s390_s16 }
  0xd9   : > { %p2156_p5 = scmp.ne.s32.totalorder %s390_s16, %s2155_s11  ;;  %p2164_p4 = scmp.lt.s32.totalorder %s2155_s11, %s2155_s11 }
  0xdb   : > { %p2158_p7 = pnand %p2156_p5, %p2449_p8  ;;  %p2165_p11 = por %p2164_p4, %p2163_p10 }
  0xdd   : > { %p2159_p9 = pneg %p2158_p7 }
  0xdf   : > { %p2166_p12 = pnand %p2165_p11, %p2159_p9 }
  0xe1   : > { %2169 = shalt.err (!%p2166_p12)
}
  0xe2   : > { %1786 = dma.hbm_to_vmem [thread:$0]  (!%p2433_p6), %s3076_s8, 32, %s390_s16, [#allocation15]  }
  0xe3   : > { %s2325_s14 = smov [#allocation19]   ;;  %s2170_s27 = scalar_lea.hbm %s3078_s10, 64 }
  0xe4   : > { %s411_s28 = sshll.u32 %s2325_s14, 4  ;;  %p2171_p13 = scmp.ne.s32.totalorder %s3078_s10, %s2170_s27  ;;  %s412_s28 = int_to_ptr.vmem [resolvable:$true] %s411_s28 }
  0xe5   : > { %p2177_p3 = scmp.lt.u32.totalorder %s2170_s27, %s3078_s10 }
  0xe6   : > { %p2173_p0 = pnand %p2171_p13, %p2449_p8 }
  0xe8   : > { %p2174_p1 = pneg %p2173_p0 }
  0xea   : > { %p2179_p2 = pnand %p2177_p3, %p2174_p1 }
  0xec   : > { %2182 = shalt.err (!%p2179_p2)
}
  0xed   : > { %s2183_s16 = scalar_lea.vmem %s412_s28, 64  ;;  %p2191_p10 = scmp.lt.s32.totalorder %s412_s28, %s412_s28 }
  0xee   : > { %p2184_p5 = scmp.ne.s32.totalorder %s412_s28, %s2183_s16  ;;  %p2192_p4 = scmp.lt.s32.totalorder %s2183_s16, %s2183_s16 }
  0xf0   : > { %p2186_p7 = pnand %p2184_p5, %p2449_p8  ;;  %p2193_p11 = por %p2192_p4, %p2191_p10 }
  0xf2   : > { %p2187_p9 = pneg %p2186_p7 }
  0xf4   : > { %p2194_p12 = pnand %p2193_p11, %p2187_p9 }
  0xf6   : > { %2197 = shalt.err (!%p2194_p12)
}
  0xf7   : > { %1792 = dma.hbm_to_vmem [thread:$0]  (!%p2433_p6), %s3078_s10, 64, %s412_s28, [#allocation18]  }
  0xf8   : > { %s1645_s25 = sadd.s32 4294967294, %s2314_s20   ;;  %s2645_s29 = sadd.s32 1, %s2314_s20  }
  0xf9   : > { %s36_s15 = ssub.s32 %s2314_s20, %s2645_s29  ;;  %s39_s14 = sadd.s32 1, %s2310_s19 }
  0xfa   : > { %p37_p8 = scmp.eq.s32.totalorder %s36_s15, 0  ;;  %p46_p13 = scmp.ne.s32.totalorder %s2310_s19, %s2306_s18 }
  0xfb   : > { %p47_p0 = scmp.eq.s32.totalorder %s2314_s20, 0  ;;  %p52_p1 = scmp.ne.s32.totalorder %s2306_s18, %s2302_s17 }
  0xfc   : > { %s2656_s24 = scalar_select %p37_p8, %s2310_s19, %s39_s14  }
  0xfd   : > { %p2658_p3 = por %p47_p0, %p46_p13  ;;  %p3095_p2 = scmp.eq.s32.totalorder %s2415_s23, 0 }
  0xfe   : > { %p286_p5 = scmp.eq.s32.totalorder %s2415_s23, 1  ;;  %p292_p7 = scmp.eq.s32.totalorder %s1645_s25, 1 }
  0xff   : > { %p2664_p6 = por %p3095_p2, %p52_p1  ;;  %p1811_p9 = scmp.lt.s32.totalorder %s2314_s20, 2 }
 0x100   : > { %s422_s27 = sand.u32 1, %s2310_s19   ;;  %p2671_p10 = por %p286_p5, %p46_p13 }
 0x101   : > { %p2675_p4 = por %p292_p7, %p52_p1  ;;  %s1658_s26 = sshll.u32 %s422_s27, 3 }
 0x102   : > { %s3097_s30 = scalar_select %p2671_p10, 1, 0 }
 0x103   : > { %s3098_s13 = scalar_select %p2675_p4, 1, 0 }
 0x104   : > { %s1700_s12 = sshll.u32 %s2314_s20, 7  ;;  %s426_s25 = scalar_lea.vmem [#allocation2], %s1658_s26 }
 0x105   : > { %s2683_s22 = scalar_lea.hbm %s3068_s0, %s1700_s12  ;;  %s434_s15 = sshll.u32 %s426_s25, 4  ;;  %s2685_s15 = int_to_ptr.vmem [resolvable:$true] %s434_s15 }
 0x106   : > { %p2689_p11 = pnand %p1811_p9, %p2658_p3  ;;  %s423_s1 = scalar_lea.sflag [#allocation3], %s422_s27 }
 0x107   : > { %s2198_s2 = scalar_lea.hbm %s2683_s22, 128  ;;  %s2203_s16 = scalar_lea.hbm %s3068_s0, 256 }
 0x108   : > { %p2199_p12 = scmp.ne.s32.totalorder %s2683_s22, %s2198_s2  ;;  %p2200_p8 = pneg %p2689_p11 }
 0x109   : > { %p2204_p1 = scmp.lt.u32.totalorder %s2683_s22, %s3068_s0  ;;  %p2205_p3 = scmp.lt.u32.totalorder %s2203_s16, %s2198_s2 }
 0x10a   : > { %p2201_p13 = pnand %p2200_p8, %p2199_p12  ;;  %p2207_p5 = scmp.lt.u32.totalorder %s2198_s2, %s2683_s22 }
 0x10b   : > { %p2206_p2 = por %p2205_p3, %p2204_p1 }
 0x10c   : > { %p2202_p0 = pneg %p2201_p13 }
 0x10d   : > { %p2208_p7 = por %p2207_p5, %p2206_p2 }
 0x10f   : > { %p2209_p9 = pnand %p2208_p7, %p2202_p0 }
 0x111   : > { %2212 = shalt.err (!%p2209_p9)
}
 0x112   : > { %s2213_s27 = scalar_lea.vmem %s2685_s15, 128  ;;  %s2326_s25 = smov [#allocation2]  }
 0x113   : > { %p2214_p12 = scmp.ne.s32.totalorder %s2685_s15, %s2213_s27  ;;  %s2218_s26 = sshll.u32 %s2326_s25, 4  ;;  %s2219_s26 = int_to_ptr.vmem [resolvable:$false] %s2218_s26 }
 0x114   : > { %s2220_s12 = scalar_lea.vmem %s2219_s26, 256  ;;  %p2221_p10 = scmp.lt.s32.totalorder %s2685_s15, %s2219_s26 }
 0x115   : > { %p2216_p13 = pnand %p2214_p12, %p2200_p8  ;;  %p2222_p1 = scmp.lt.s32.totalorder %s2220_s12, %s2213_s27 }
 0x117   : > { %p2217_p4 = pneg %p2216_p13  ;;  %p2223_p3 = por %p2222_p1, %p2221_p10 }
 0x119   : > { %p2224_p2 = pnand %p2223_p3, %p2217_p4 }
 0x11b   : > { %2227 = shalt.err (!%p2224_p2)
}
 0x11c   : > { %1796 = dma.hbm_to_vmem [thread:$0]  (!%p2689_p11), %s2683_s22, 128, %s2685_s15, %s423_s1  }
 0x11d   : > { %s3100_s2 = sld [smem:[#allocation28_spill]] }
 0x123   : > { %p3101_p0 = scmp.ne.s32.totalorder %s3100_s2, 0 }
 0x124   : > { %s2721_s16 = sand.u32 (!%p3101_p0), 1, %s2306_s18  }
 0x125   : > { %443 = sbr.rel (%p3101_p0) target bundleno = 2779 (0xadb), region = 64  ;;  %s1662_s21 = sshll.u32 (!%p3101_p0), %s2721_s16, 3 }
 0x126   : > { %s446_s11 = scalar_lea.sflag (!%p3101_p0), [#allocation3], %s2721_s16  ;;  %s449_s27 = scalar_lea.vmem (!%p3101_p0), [#allocation2], %s1662_s21 }
 0x12c   : > { %2273 = dma.done.wait (%p2664_p6), %s446_s11, 128  }
 0x12d   : > { %2275 = vsyncadd (%p2664_p6), %s446_s11, 4294967168  ;;  %p3102_p10 = scmp.eq.s32.totalorder %s2415_s23, 0 }
 0x12f   : > { %2277 = dma.done.wait (%p3102_p10), [#allocation6], 128   ;;  %p3103_p4 = pmov %p3102_p10 }
 0x131   : > { %2279 = vsyncadd (%p3103_p4), [#allocation6], 4294967168  ;;  %p3104_p11 = pmov %p3103_p4 }
 0x132   : > { %p3105_p8 = pmov %p3103_p4 }
 0x133   : > { %2281 = dma.done.wait (%p3104_p11), [#allocation9], 64  }
 0x134   : > { %2283 = vsyncadd (%p3105_p8), [#allocation9], 4294967232  ;;  %p3106_p5 = pmov %p3103_p4 }
 0x135   : > { %p3107_p7 = pmov %p3103_p4 }
 0x136   : > { %2285 = dma.done.wait (%p3106_p5), [#allocation12], 64  }
 0x137   : > { %2287 = vsyncadd (%p3107_p7), [#allocation12], 4294967232  ;;  %p3108_p6 = pmov %p3103_p4 }
 0x138   : > { %p3109_p9 = pmov %p3103_p4 }
 0x139   : > { %2289 = dma.done.wait (%p3108_p6), [#allocation15], 64  }
 0x13a   : > { %2291 = vsyncadd (%p3109_p9), [#allocation15], 4294967232  ;;  %p3110_p12 = pmov %p3103_p4 }
 0x13b   : > { %p3111_p13 = pmov %p3103_p4 }
 0x13c   : > { %2293 = dma.done.wait (%p3110_p12), [#allocation18], 128  }
 0x13d   : > { %2295 = vsyncadd (%p3111_p13), [#allocation18], 4294967168  ;;  %v2751_v0 = vld [vmem:[%s449_s27] sm:$0xff]  ;;  %s2327_s1 = smov 112   ;;  %s2328_s28 = smov 16   ;;  %v529_v3 = vlaneseq  ;;  %v2331_v17 = vmov 0.0  }
 0x13e   : > { %551 = vrot.lane.b32.xlu1 %v2751_v0, %s2327_s1  ;;  %545 = vrot.lane.b32.xlu0 %v2751_v0, %s2328_s28  ;;  %v2759_v1 = vcombine.high %v2751_v0, %v2751_v0  ;;  %s2329_s22 = smov 1   ;;  %s2330_s15 = smov 127   ;;  %vm652_vm9 = vcmask 1043456   ;;  %vm662_vm10 = vcmask 293888   ;;  %v862_v27 = vld [vmem:[#allocation7] sm:$0xf] }
 0x13f   : > { %v2769_v4 = vand.u32 127, %v529_v3  ;;  %736 = vmatprep.mubr.f32.mxu0 %v2331_v17  ;;  %936 = vmatprep.mubr.f32.mxu1 %v2331_v17  ;;  %vm977_vm11 = vcmask 31744   ;;  %vm1292_vm12 = vcmask 1041408   ;;  %vm1288_vm13 = vcmask 15360   ;;  %s1701_s14 = sshll.u32 %s2415_s23, 7  ;;  %s527_s25 = scalar_lea.vmem [#allocation20], %s1662_s21 }
 0x140   : > { %v1871_v2 = vpack.i.bf16 %v2759_v1, %v2751_v0  ;;  %s1480_s26 = sshll.u32 %s527_s25, 4  ;;  %s3120_s11 = sld [smem:[#allocation31_spill]]  ;;  %s3026_s26 = int_to_ptr.vmem [resolvable:$true] %s1480_s26 }
 0x141   : > { %vm555_vm0 = vcmp.lt.s32.totalorder %v2769_v4, 112  ;;  %vm534_vm1 = vcmp.lt.s32.totalorder %v2769_v4, 16  ;;  %v2782_v12 = vadd.s32 128, %v2769_v4  ;;  %vm574_vm3 = vcmp.lt.s32.totalorder %v2769_v4, 1  ;;  %p3121_p3 = scmp.ne.s32.totalorder %s3097_s30, 0  ;;  %s2333_s23 = smov [#allocation20]  }
 0x142   : > { %553 = vrot.lane.b32.xlu1 %v2759_v1, %s2327_s1  ;;  %547 = vrot.lane.b32.xlu0 %v2759_v1, %s2328_s28  ;;  %vm581_vm4 = vcmp.lt.s32.totalorder %v2769_v4, 127  ;;  %v532_v25 = vand.u32 15, %v2769_v4  ;;  %s2232_s21 = sshll.u32 %s2333_s23, 4  ;;  %s2233_s21 = int_to_ptr.vmem [resolvable:$false] %s2232_s21 }
 0x143   : > { %vm537_vm2 = vcmp.ge.s32.totalorder %v2782_v12, 240  ;;  %v533_v20 = vand.u32 15, %v2782_v12  ;;  %p2235_p10 = scmp.lt.s32.totalorder %s3026_s26, %s2233_s21 }
 0x144   : > { %vm2823_vm6 = vcmp.eq.s32.totalorder %v532_v25, 15  ;;  %vm2829_vm7 = vcmp.eq.s32.totalorder %v532_v25, 0 }
 0x145   : > { %vm2813_vm5 = vcmp.eq.s32.totalorder %v533_v20, 0  ;;  %vm2833_vm8 = vcmp.eq.s32.totalorder %v533_v20, 15 }
 0x146   : > { %1872 = vrot.lane.b32.xlu0 %v1871_v2, %s2329_s22  ;;  %1877 = vrot.lane.b32.xlu1 %v1871_v2, %s2330_s15  ;;  %s3024_s27 = scalar_lea.hbm %s3120_s11, %s1701_s14 }
 0x1b0   : > { %v552_v5 = vpop.permute.xlu1 %551  ;;  %v546_v6 = vpop.permute.xlu0 %545 }
 0x1b4   : > { %v554_v7 = vpop.permute.xlu1 %553  ;;  %v548_v8 = vpop.permute.xlu0 %547 }
 0x1b5   : > { %v2775_v9 = vsel %vm555_vm0, %v552_v5, %v554_v7  ;;  %v549_v10 = vsel %vm534_vm1, %v546_v6, %v548_v8  ;;  %v550_v11 = vsel %vm534_vm1, %v548_v8, %v546_v6  ;;  %v557_v15 = vsel %vm555_vm0, %v554_v7, %v552_v5 }
 0x1b6   : > { %v2787_v13 = vsel %vm534_vm1, %v2775_v9, %v550_v11  ;;  %612 = vrot.lane.b32.xlu0 %v2775_v9, %s2329_s22  ;;  %v2799_v16 = vsel %vm537_vm2, %v549_v10, %v557_v15  ;;  %v631_v47 = vrot.slane %v549_v10, 4  ;;  %v648_v3 = vrot.slane %v2775_v9, 4 }
 0x1b7   : > { %v1886_v14 = vpack.i.bf16 %v549_v10, %v2787_v13  ;;  %v630_v44 = vrot.slane %v2787_v13, 4  ;;  %v649_v5 = vrot.slane %v2799_v16, 4 }
 0x1b8   : > { %v1873_v18 = vpop.permute.xlu0 %1872  ;;  %v1878_v19 = vpop.permute.xlu1 %1877 }
 0x1b9   : > { %1887 = vrot.lane.b32.xlu1 %v1886_v14, %s2330_s15  ;;  %v1875_v21 = vunpack.i.h.bf16 %v1873_v18  ;;  %v1874_v22 = vunpack.i.l.bf16 %v1873_v18  ;;  %v1880_v23 = vunpack.i.h.bf16 %v1878_v19  ;;  %v1879_v24 = vunpack.i.l.bf16 %v1878_v19 }
 0x1ba   : > { %1882 = vrot.lane.b32.xlu0 %v1886_v14, %s2329_s22 }
 0x1bb   : > { %v600_v28 = vsel %vm574_vm3, %v1874_v22, %v1875_v21  ;;  %v607_v29 = vsel %vm581_vm4, %v1880_v23, %v1879_v24  ;;  %v601_v30 = vsel %vm574_vm3, %v1875_v21, %v1874_v22  ;;  %v606_v32 = vsel %vm581_vm4, %v1879_v24, %v1880_v23  ;;  %v661_v24 = vld [vmem:[#allocation5] sm:$0xf] }
 0x1bc   : > { %v609_v39 = vsel %vm2813_vm5, %v607_v29, %v600_v28  ;;  %v610_v40 = vsel %vm2823_vm6, %v601_v30, %v606_v32  ;;  %v608_v43 = vsel %vm2829_vm7, %v606_v32, %v601_v30  ;;  %v611_v48 = vsel %vm2833_vm8, %v600_v28, %v607_v29 }
 0x1bd   : > { %614 = vrot.lane.b32.xlu1 %v2799_v16, %s2329_s22  ;;  %v637_v52 = vrot.slane %v609_v39, 4  ;;  %v642_v53 = vrot.slane %v610_v40, 4  ;;  %v636_v56 = vrot.slane %v608_v43, 4  ;;  %v643_v61 = vrot.slane %v611_v48, 4 }
 0x1be   : > { %618 = vrot.lane.b32.xlu0 %v2775_v9, %s2330_s15 }
 0x1bf   : > { %v657_v19 = vsel %vm652_vm9, %v2751_v0, %v642_v53 }
 0x1c1   : > { %620 = vrot.lane.b32.xlu1 %v2799_v16, %s2330_s15  ;;  %v658_v16 = vsel %vm652_vm9, %v2759_v1, %v643_v61 }
 0x228   : > { %v613_v26 = vpop.permute.xlu0 %612 }
 0x22b   : > { %v1888_v35 = vpop.permute.xlu1 %1887 }
 0x22c   : > { %v1890_v36 = vunpack.i.h.bf16 %v1888_v35  ;;  %v1889_v37 = vunpack.i.l.bf16 %v1888_v35  ;;  %v1883_v38 = vpop.permute.xlu0 %1882 }
 0x22d   : > { %v1885_v41 = vunpack.i.h.bf16 %v1883_v38  ;;  %v1884_v42 = vunpack.i.l.bf16 %v1883_v38 }
 0x22e   : > { %v582_v45 = vsel %vm581_vm4, %v1889_v37, %v1890_v36  ;;  %v583_v46 = vsel %vm581_vm4, %v1890_v36, %v1889_v37 }
 0x22f   : > { %v576_v49 = vsel %vm574_vm3, %v1885_v41, %v1884_v42  ;;  %v615_v50 = vpop.permute.xlu1 %614  ;;  %v575_v51 = vsel %vm574_vm3, %v1884_v42, %v1885_v41 }
 0x230   : > { %v589_v54 = vsel %vm2813_vm5, %v583_v46, %v575_v51  ;;  %v595_v55 = vsel %vm2833_vm8, %v575_v51, %v583_v46  ;;  %v588_v59 = vsel %vm2829_vm7, %v582_v45, %v576_v49  ;;  %v594_v60 = vsel %vm2823_vm6, %v576_v49, %v582_v45  ;;  %v619_v6 = vpop.permute.xlu0 %618 }
 0x231   : > { %v654_v57 = vsel %vm652_vm9, %v589_v54, %v631_v47  ;;  %v656_v58 = vsel %vm652_vm9, %v595_v55, %v637_v52  ;;  %v653_v63 = vsel %vm652_vm9, %v588_v59, %v630_v44  ;;  %v655_v2 = vsel %vm652_vm9, %v594_v60, %v636_v56 }
 0x232   : > { %v1702_v62 = vpack.c.bf16 %v656_v58, %v654_v57  ;;  %v1704_v8 = vpack.c.bf16 %v655_v2, %v653_v63  ;;  %v616_v10 = vsel %vm574_vm3, %v613_v26, %v615_v50  ;;  %v617_v11 = vsel %vm574_vm3, %v615_v50, %v613_v26 }
 0x233   : > { %v621_v7 = vpop.permute.xlu1 %620 }
 0x234   : > { %v622_v13 = vsel %vm581_vm4, %v619_v6, %v621_v7  ;;  %v623_v14 = vsel %vm581_vm4, %v621_v7, %v619_v6  ;;  %1703 = vmatprep.subr.bf16.mxu0 %v1702_v62 }
 0x235   : > { %v624_v9 = vsel %vm2829_vm7, %v622_v13, %v617_v11  ;;  %v625_v15 = vsel %vm2813_vm5, %v623_v14, %v616_v10  ;;  %1705 = vmatpush1.bf16.msra.mxu0 %v1704_v8  ;;  %v627_v23 = vsel %vm2833_vm8, %v616_v10, %v623_v14  ;;  %v626_v1 = vsel %vm2823_vm6, %v617_v11, %v622_v13 }
 0x236   : > { %v660_v18 = vsel %vm652_vm9, %v625_v15, %v649_v5  ;;  %v659_v20 = vsel %vm652_vm9, %v624_v9, %v648_v3 }
 0x237   : > { %v1706_v21 = vpack.c.bf16 %v660_v18, %v658_v16  ;;  %v1708_v22 = vpack.c.bf16 %v659_v20, %v657_v19 }
 0x239   : > { %1707 = vmatprep.subr.bf16.mxu0 %v1706_v21 }
 0x23a   : > { %1709 = vmatpush1.bf16.msra.mxu0 %v1708_v22 }
 0x23b   : > { %1674 = vmatprep.subr.msk.mxu0 %vm652_vm9, %v627_v23 }
 0x23e   : > { %1675 = vmatpush1.msk.msra.mxu0 %vm652_vm9, %v626_v1 }
 0x23f   : > { %1676 = vmatmul.mubr.msk.f32.vlgmr.msra.gmra.mrb[0].mxu0 %vm662_vm10, %v661_v24 }
 0x240   : > { %1049 = vmatprep.mubr.f32.mxu0 %v2331_v17 }
 0x312   : > { %v738_v25 = vpop.f32.mrb[0].mxu0 }
 0x313   : > { %v743_v26 = vsel %vm652_vm9, %v738_v25, 0.0  ;;  %v740_v28 = vpop.f32.mrb[1].mxu0 }
 0x314   : > { %v744_v29 = vsel %vm652_vm9, %v740_v28, 0.0 }
 0x315   : > { %v745_v30 = vadd.f32 %v744_v29, %v743_v26 }
 0x317   : > { %746 = vadd.xlane.f32.xlu0 %v745_v30 }
 0x3a4   : > { %v747_v32 = vpop.xlane.xlu0 %746 }
 0x3a5   : > { %v749_v35 = vmul.f32 0.00390625, %v747_v32 }
 0x3a7   : > { %v750_v36 = vsub.f32 %v738_v25, %v749_v35  ;;  %v751_v37 = vsub.f32 %v740_v28, %v749_v35 }
 0x3a9   : > { %v752_v38 = vmul.f32 %v750_v36, %v750_v36  ;;  %v753_v39 = vmul.f32 %v751_v37, %v751_v37 }
 0x3ab   : > { %v754_v40 = vsel %vm652_vm9, %v752_v38, 0.0  ;;  %v755_v41 = vsel %vm652_vm9, %v753_v39, 0.0 }
 0x3ac   : > { %v756_v42 = vadd.f32 %v755_v41, %v754_v40 }
 0x3ae   : > { %757 = vadd.xlane.f32.xlu1 %v756_v42 }
 0x43b   : > { %v758_v43 = vpop.xlane.xlu1 %757 }
 0x43c   : > { %v759_v44 = vmul.f32 0.00390625, %v758_v43 }
 0x43e   : > { %v760_v45 = vadd.f32 1e-05, %v759_v44 }
 0x440   : > { %1914 = vrsqrt.f32 %v760_v45 }
 0x44a   : > { %v1915_v46 = vpop.eup %1914 }
 0x44b   : > { %v763_v47 = vmul.f32 %v1915_v46, %v751_v37  ;;  %v762_v48 = vmul.f32 %v1915_v46, %v750_v36 }
 0x44d   : > { %v2898_v49 = vmax.f32 %v763_v47, 0.0  ;;  %v2900_v50 = vmax.f32 %v762_v48, 0.0 }
 0x44f   : > { %768 = vrot.lane.b32.xlu1 %v2898_v49, %s2328_s28  ;;  %766 = vrot.lane.b32.xlu0 %v2900_v50, %s2328_s28  ;;  %v1896_v51 = vpack.i.bf16 %v2898_v49, %v2900_v50  ;;  %s2228_s28 = scalar_lea.vmem %s3026_s26, 128 }
 0x450   : > { %p2229_p1 = scmp.ne.s32.totalorder %s3026_s26, %s2228_s28 }
 0x452   : > { %p2230_p2 = pnand %p2229_p1, %p3121_p3 }
 0x453   : > { %774 = vrot.lane.b32.xlu1 %v2898_v49, %s2327_s1  ;;  %772 = vrot.lane.b32.xlu0 %v2900_v50, %s2327_s1  ;;  %s1466_s1 = scalar_lea.sflag [#allocation4], %s2721_s16 }
 0x454   : > { %p2231_p0 = pneg %p2230_p2 }
 0x457   : > { %1897 = vrot.lane.b32.xlu1 %v1896_v51, %s2330_s15  ;;  %1892 = vrot.lane.b32.xlu0 %v1896_v51, %s2329_s22 }
 0x4c1   : > { %v769_v52 = vpop.permute.xlu1 %768  ;;  %v767_v53 = vpop.permute.xlu0 %766 }
 0x4c2   : > { %v771_v56 = vsel %vm534_vm1, %v769_v52, %v767_v53  ;;  %v770_v58 = vsel %vm534_vm1, %v767_v53, %v769_v52 }
 0x4c3   : > { %v833_v1 = vrot.slane %v770_v58, 4 }
 0x4c5   : > { %v775_v54 = vpop.permute.xlu1 %774  ;;  %v773_v55 = vpop.permute.xlu0 %772 }
 0x4c6   : > { %v2918_v57 = vsel %vm555_vm0, %v773_v55, %v775_v54  ;;  %v777_v61 = vsel %vm555_vm0, %v775_v54, %v773_v55 }
 0x4c7   : > { %v778_v59 = vsel %vm534_vm1, %v2918_v57, %v771_v56  ;;  %814 = vrot.lane.b32.xlu0 %v2918_v57, %s2329_s22  ;;  %v781_v62 = vsel %vm537_vm2, %v770_v58, %v777_v61  ;;  %v850_v47 = vrot.slane %v2918_v57, 4 }
 0x4c8   : > { %v1906_v60 = vpack.i.bf16 %v770_v58, %v778_v59  ;;  %v832_v25 = vrot.slane %v778_v59, 4  ;;  %v851_v48 = vrot.slane %v781_v62, 4 }
 0x4c9   : > { %v1898_v63 = vpop.permute.xlu1 %1897  ;;  %v1893_v2 = vpop.permute.xlu0 %1892 }
 0x4ca   : > { %1907 = vrot.lane.b32.xlu1 %v1906_v60, %s2330_s15  ;;  %v1900_v3 = vunpack.i.h.bf16 %v1898_v63  ;;  %v1899_v5 = vunpack.i.l.bf16 %v1898_v63  ;;  %v1895_v6 = vunpack.i.h.bf16 %v1893_v2  ;;  %v1894_v7 = vunpack.i.l.bf16 %v1893_v2 }
 0x4cb   : > { %1902 = vrot.lane.b32.xlu0 %v1906_v60, %s2329_s22 }
 0x4cc   : > { %v809_v10 = vsel %vm581_vm4, %v1900_v3, %v1899_v5  ;;  %v802_v12 = vsel %vm574_vm3, %v1894_v7, %v1895_v6  ;;  %v808_v11 = vsel %vm581_vm4, %v1899_v5, %v1900_v3  ;;  %v803_v13 = vsel %vm574_vm3, %v1895_v6, %v1894_v7 }
 0x4cd   : > { %v811_v18 = vsel %vm2813_vm5, %v809_v10, %v802_v12  ;;  %v812_v19 = vsel %vm2823_vm6, %v803_v13, %v808_v11  ;;  %v810_v22 = vsel %vm2829_vm7, %v808_v11, %v803_v13  ;;  %v813_v26 = vsel %vm2833_vm8, %v802_v12, %v809_v10 }
 0x4ce   : > { %816 = vrot.lane.b32.xlu1 %v781_v62, %s2329_s22  ;;  %v839_v32 = vrot.slane %v811_v18, 4  ;;  %v844_v35 = vrot.slane %v812_v19, 4  ;;  %v838_v38 = vrot.slane %v810_v22, 4  ;;  %v845_v43 = vrot.slane %v813_v26, 4  ;;  %v1138_v18 = vld [vmem:[#allocation16] sm:$0x3] }
 0x4cf   : > { %820 = vrot.lane.b32.xlu0 %v2918_v57, %s2330_s15  ;;  %v1057_v19 = vld [vmem:[#allocation13] sm:$0x3]  ;;  %s2234_s22 = scalar_lea.vmem %s2233_s21, 256 }
 0x4d0   : > { %v859_v60 = vsel %vm652_vm9, %v2898_v49, %v845_v43  ;;  %p2236_p4 = scmp.lt.s32.totalorder %s2234_s22, %s2228_s28 }
 0x4d2   : > { %822 = vrot.lane.b32.xlu1 %v781_v62, %s2330_s15  ;;  %v858_v62 = vsel %vm652_vm9, %v2900_v50, %v844_v35  ;;  %p2237_p11 = por %p2236_p4, %p2235_p10 }
 0x4d4   : > { %p2238_p8 = pnand %p2237_p11, %p2231_p0 }
 0x539   : > { %v815_v8 = vpop.permute.xlu0 %814 }
 0x53c   : > { %v1908_v14 = vpop.permute.xlu1 %1907 }
 0x53d   : > { %v1910_v9 = vunpack.i.h.bf16 %v1908_v14  ;;  %v1909_v15 = vunpack.i.l.bf16 %v1908_v14  ;;  %v1903_v16 = vpop.permute.xlu0 %1902 }
 0x53e   : > { %v1905_v20 = vunpack.i.h.bf16 %v1903_v16  ;;  %v1904_v21 = vunpack.i.l.bf16 %v1903_v16  ;;  %v2332_v16 = vmov 0  }
 0x53f   : > { %v792_v23 = vsel %vm581_vm4, %v1909_v15, %v1910_v9  ;;  %v793_v24 = vsel %vm581_vm4, %v1910_v9, %v1909_v15  ;;  %v969_v15 = vld [vmem:[#allocation10] sm:$0x3]  ;;  %1912 = vset.pattern.permute.xlu1 %v2332_v16  ;;  %1911 = vset.pattern.permute.xlu0 %v2332_v16 }
 0x540   : > { %v787_v28 = vsel %vm574_vm3, %v1905_v20, %v1904_v21  ;;  %v817_v29 = vpop.permute.xlu1 %816  ;;  %v786_v30 = vsel %vm574_vm3, %v1904_v21, %v1905_v20  ;;  %v1373_v20 = vld [vmem:[#allocation19] sm:$0xf] }
 0x541   : > { %v795_v36 = vsel %vm2813_vm5, %v793_v24, %v786_v30  ;;  %v797_v37 = vsel %vm2833_vm8, %v786_v30, %v793_v24  ;;  %v794_v41 = vsel %vm2829_vm7, %v792_v23, %v787_v28  ;;  %v796_v42 = vsel %vm2823_vm6, %v787_v28, %v792_v23  ;;  %v821_v51 = vpop.permute.xlu0 %820  ;;  %v968_v30 = vld [vmem:[#allocation8] sm:$0x3] }
 0x542   : > { %v855_v39 = vsel %vm652_vm9, %v795_v36, %v833_v1  ;;  %v857_v40 = vsel %vm652_vm9, %v797_v37, %v839_v32  ;;  %v854_v45 = vsel %vm652_vm9, %v794_v41, %v832_v25  ;;  %v856_v46 = vsel %vm652_vm9, %v796_v42, %v838_v38  ;;  %v1056_v32 = vld [vmem:[#allocation11] sm:$0x3] }
 0x543   : > { %v1710_v44 = vpack.c.bf16 %v857_v40, %v855_v39  ;;  %v1712_v53 = vpack.c.bf16 %v856_v46, %v854_v45  ;;  %v818_v54 = vsel %vm574_vm3, %v815_v8, %v817_v29  ;;  %v819_v55 = vsel %vm574_vm3, %v817_v29, %v815_v8 }
 0x544   : > { %v823_v52 = vpop.permute.xlu1 %822 }
 0x545   : > { %v824_v56 = vsel %vm581_vm4, %v821_v51, %v823_v52  ;;  %v825_v58 = vsel %vm581_vm4, %v823_v52, %v821_v51  ;;  %1711 = vmatprep.subr.bf16.mxu1 %v1710_v44 }
 0x546   : > { %v826_v57 = vsel %vm2829_vm7, %v824_v56, %v819_v55  ;;  %v827_v59 = vsel %vm2813_vm5, %v825_v58, %v818_v54  ;;  %1713 = vmatpush1.bf16.msra.mxu1 %v1712_v53  ;;  %v829_v33 = vsel %vm2833_vm8, %v818_v54, %v825_v58  ;;  %v828_v49 = vsel %vm2823_vm6, %v819_v55, %v824_v56 }
 0x547   : > { %v861_v61 = vsel %vm652_vm9, %v827_v59, %v851_v48  ;;  %v860_v63 = vsel %vm652_vm9, %v826_v57, %v850_v47  ;;  %v1372_v57 = vld [vmem:[#allocation17] sm:$0xf] }
 0x548   : > { %v1714_v4 = vpack.c.bf16 %v861_v61, %v859_v60  ;;  %v1716_v2 = vpack.c.bf16 %v860_v63, %v858_v62 }
 0x54a   : > { %1715 = vmatprep.subr.bf16.mxu1 %v1714_v4 }
 0x54b   : > { %1717 = vmatpush1.bf16.msra.mxu1 %v1716_v2 }
 0x54c   : > { %1677 = vmatprep.subr.msk.mxu1 %vm652_vm9, %v829_v33 }
 0x54f   : > { %1678 = vmatpush1.msk.msra.mxu1 %vm652_vm9, %v828_v49 }
 0x550   : > { %1679 = vmatmul.mubr.msk.f32.vlgmr.msra.gmra.mrb[0].mxu1 %vm662_vm10, %v862_v27 }
 0x551   : > { %1130 = vmatprep.mubr.f32.mxu1 %v2331_v17 }
 0x623   : > { %v938_v50 = vpop.f32.mrb[0].mxu1 }
 0x624   : > { %v943_v3 = vsel %vm652_vm9, %v938_v50, 0.0  ;;  %v940_v5 = vpop.f32.mrb[1].mxu1 }
 0x625   : > { %v944_v6 = vsel %vm652_vm9, %v940_v5, 0.0 }
 0x626   : > { %v945_v34 = vadd.f32 %v944_v6, %v943_v3 }
 0x628   : > { %946 = vadd.xlane.f32.xlu0 %v945_v34 }
 0x63e   : > { %1141 = vperm.xlu0 %1911, %v1138_v18  }
 0x6b5   : > { %v947_v7 = vpop.xlane.xlu0 %946 }
 0x6b6   : > { %v948_v8 = vmul.f32 0.00390625, %v947_v7 }
 0x6b8   : > { %v949_v10 = vsub.f32 %v938_v50, %v948_v8  ;;  %v950_v12 = vsub.f32 %v940_v5, %v948_v8 }
 0x6ba   : > { %v951_v31 = vmul.f32 %v949_v10, %v949_v10  ;;  %v952_v11 = vmul.f32 %v950_v12, %v950_v12 }
 0x6bc   : > { %v953_v13 = vsel %vm652_vm9, %v951_v31, 0.0  ;;  %v954_v14 = vsel %vm652_vm9, %v952_v11, 0.0 }
 0x6bd   : > { %v955_v9 = vadd.f32 %v954_v14, %v953_v13  ;;  %v1142_v41 = vpop.permute.xlu0 %1141 }
 0x6bf   : > { %956 = vadd.xlane.f32.xlu1 %v955_v9 }
 0x6d0   : > { %972 = vperm.xlu1 %1912, %v969_v15  }
 0x6d4   : > { %1060 = vperm.xlu1 %1912, %v1057_v19  }
 0x6d8   : > { %1376 = vperm.xlu1 %1912, %v1373_v20  }
 0x74c   : > { %v957_v21 = vpop.xlane.xlu1 %956 }
 0x74d   : > { %v958_v22 = vmul.f32 0.00390625, %v957_v21 }
 0x74f   : > { %v959_v23 = vadd.f32 1e-05, %v958_v22 }
 0x750   : > { %v973_v35 = vpop.permute.xlu1 %972 }
 0x751   : > { %1916 = vrsqrt.f32 %v959_v23 }
 0x754   : > { %v1061_v39 = vpop.permute.xlu1 %1060 }
 0x758   : > { %v1377_v59 = vpop.permute.xlu1 %1376 }
 0x75b   : > { %v1917_v24 = vpop.eup %1916 }
 0x75c   : > { %v961_v1 = vmul.f32 %v1917_v24, %v949_v10  ;;  %v962_v25 = vmul.f32 %v1917_v24, %v950_v12 }
 0x75e   : > { %v965_v26 = vcombine.low %v961_v1, %v962_v25 }
 0x760   : > { %v967_v28 = vadd.f32 %v965_v26, %v2751_v0  ;;  %v1137_v0 = vld [vmem:[#allocation14] sm:$0x3] }
 0x762   : > { %v976_v29 = vcombine.high %v967_v28, %v967_v28 }
 0x764   : > { %1680 = vmatprep.subr.msk.mxu0 %vm652_vm9, %v976_v29  ;;  %1683 = vmatprep.subr.msk.mxu1 %vm652_vm9, %v976_v29 }
 0x765   : > { %1681 = vmatpush1.msk.msra.mxu0 %vm652_vm9, %v967_v28  ;;  %1684 = vmatpush1.msk.msra.mxu1 %vm652_vm9, %v967_v28 }
 0x766   : > { %1682 = vmatmul.mubr.msk.f32.vlgmr.msra.gmra.mrb[2].mxu0 %vm977_vm11, %v968_v30  ;;  %1686 = vmatprep.subr.msk.mxu0 %vm652_vm9, %v976_v29 }
 0x767   : > { %1687 = vmatpush1.msk.msra.mxu0 %vm652_vm9, %v967_v28  ;;  %1211 = vmatprep.mubr.f32.mxu0 %v2331_v17 }
 0x768   : > { %1685 = vmatmul.mubr.msk.f32.vlgmr.msra.gmra.mrb[2].mxu1 %vm977_vm11, %v1056_v32 }
 0x76a   : > { %1688 = vmatmul.mubr.msk.f32.vlgmr.msra.gmra.mrb[4].mxu0 %vm977_vm11, %v1137_v0 }
 0x76b   : > { %1363 = vmatprep.mubr.f32.mxu0 %v2331_v17 }
 0x839   : > { %v1051_v36 = vpop.f32.mrb[2].mxu0 }
 0x83a   : > { %v1053_v37 = vpop.f32.mrb[3].mxu0  ;;  %v1052_v51 = vadd.f32 %v1051_v36, %v973_v35 }
 0x83b   : > { %v1054_v38 = vadd.f32 %v1053_v37, %v973_v35  ;;  %v1132_v40 = vpop.f32.mrb[2].mxu1 }
 0x83c   : > { %v1133_v42 = vadd.f32 %v1132_v40, %v1061_v39  ;;  %v1134_v43 = vpop.f32.mrb[3].mxu1 }
 0x83d   : > { %v1213_v44 = vpop.f32.mrb[4].mxu0  ;;  %1282 = vmatprep.mubr.f32.mxu1 %v1054_v38  ;;  %v1135_v45 = vadd.f32 %v1134_v43, %v1061_v39 }
 0x83e   : > { %v1215_v46 = vpop.f32.mrb[5].mxu0  ;;  %v1214_v48 = vadd.f32 %v1213_v44, %v1142_v41 }
 0x83f   : > { %v1216_v47 = vadd.f32 %v1215_v46, %v1142_v41  ;;  %1689 = vmatprep.subr.msk.mxu0 %vm1292_vm12, %v1135_v45 }
 0x840   : > { %1690 = vmatpush1.msk.msra.mxu0 %vm1292_vm12, %v1133_v42 }
 0x841   : > { %1218 = vmatprep.subr.mxu1 %v1216_v47 }
 0x842   : > { %1219 = vmatpush1.xpose.msra.mxu1 %v1214_v48 }
 0x845   : > { %1283 = vmatmul.mubr.f32.vlgmr.msra.gmra.mrb[4].mxu1 %v1052_v51 }
 0x846   : > { %1452 = vmatprep.mubr.f32.mxu1 %v2331_v17 }
 0x918   : > { %v1284_v52 = vpop.f32.mrb[4].mxu1 }
 0x919   : > { %v1286_v53 = vpop.f32.mrb[5].mxu1  ;;  %1691 = vmatmul.mubr.msk.f32.vlgmr.msra.gmra.mrb[6].mxu0 %vm1288_vm13, %v1284_v52 }
 0x9ec   : > { %v1365_v54 = vpop.f32.mrb[6].mxu0 }
 0x9ed   : > { %v1367_v55 = vpop.f32.mrb[7].mxu0  ;;  %v1370_v58 = vmul.f32 0.00390625, %v1365_v54 }
 0x9ee   : > { %v1371_v56 = vmul.f32 0.00390625, %v1367_v55 }
 0x9f0   : > { %1692 = vmatprep.subr.msk.mxu1 %vm1292_vm12, %v1371_v56 }
 0x9f1   : > { %1693 = vmatpush1.msk.msra.mxu1 %vm1292_vm12, %v1370_v58 }
 0x9f2   : > { %1694 = vmatmul.mubr.msk.f32.vlgmr.msra.gmra.mrb[6].mxu1 %vm1288_vm13, %v1372_v57 }
 0xac5   : > { %v1454_v17 = vpop.f32.mrb[6].mxu1 }
 0xac6   : > { %v1455_v60 = vadd.f32 %v1454_v17, %v1377_v59  ;;  %v1456_v61 = vpop.f32.mrb[7].mxu1 }
 0xac7   : > { %v1457_v62 = vadd.f32 %v1456_v61, %v1377_v59 }
 0xac9   : > { %v1461_v63 = vcombine.low %v1455_v60, %v1457_v62 }
 0xacb   : > { %v1463_v4 = vadd.f32 %v1461_v63, %v967_v28 }
 0xacd   : > { %1464 = vst [vmem:[%s527_s25] sm:$0xff] %v1463_v4 }
 0xace   : > { %2241 = shalt.err (!%p2238_p8)
}
 0xacf   : > { %s2242_s16 = scalar_lea.hbm %s3024_s27, 128  ;;  %s2246_s25 = scalar_lea.hbm %s3120_s11, 256 }
 0xad0   : > { %p2243_p5 = scmp.ne.s32.totalorder %s3024_s27, %s2242_s16  ;;  %p2247_p9 = scmp.lt.u32.totalorder %s3024_s27, %s3120_s11 }
 0xad1   : > { %p2248_p12 = scmp.lt.u32.totalorder %s2246_s25, %s2242_s16  ;;  %p2250_p1 = scmp.lt.u32.totalorder %s2242_s16, %s3024_s27 }
 0xad2   : > { %p2244_p7 = pnand %p2243_p5, %p3121_p3 }
 0xad3   : > { %p2249_p13 = por %p2248_p12, %p2247_p9 }
 0xad4   : > { %p2245_p6 = pneg %p2244_p7 }
 0xad5   : > { %p2251_p2 = por %p2250_p1, %p2249_p13 }
 0xad7   : > { %p2252_p0 = pnand %p2251_p2, %p2245_p6 }
 0xad9   : > { %2255 = shalt.err (!%p2252_p0)
}
 0xada   : > { %1760 = dma.vmem_to_hbm [thread:$0]  (%p3121_p3), %s3026_s26, 128, %s3024_s27, %s1466_s1  }
 0xadb PF: > { %s1492_s28 = sand.u32 1, %s2302_s17   ;;  %p3122_p10 = scmp.ne.s32.totalorder %s3098_s13, 0 }
 0xadc   : > { %p3123_p4 = scmp.ge.s32.totalorder %s2314_s20, 2  ;;  %s1493_s23 = scalar_lea.sflag [#allocation4], %s1492_s28 }
 0xade   : > { %p1798_p11 = pnand %p3123_p4, %p3122_p10 }
 0xae0   : > { %2297 = dma.done.wait (!%p1798_p11), %s1493_s23, 128  }
 0xae1   : > { %2299 = vsyncadd (!%p1798_p11), %s1493_s23, 4294967168  ;;  %p29_p8 = scmp.ge.s32.totalorder %s2645_s29, 4   ;;  %s3124_s17 = smov %s2306_s18 }
 0xae2   : > { %s3125_s18 = smov %s2310_s19  ;;  %s3126_s19 = smov %s2656_s24 }
 0xae3   : > { %s3127_s20 = smov %s2645_s29  ;;  %31 = sbr.rel (!%p29_p8) target bundleno = 14 (0xe), region = 149 }
 0xaea   :  { %1498 = vsyncpa [#allocation3], 1 }
 0xaeb   :  { %1500 = vsyncpa [#allocation3 + $0x1], 1 }
 0xaec   :  { %1501 = vsyncpa [#allocation6], 1 }
 0xaed   :  { %1502 = vsyncpa [#allocation9], 1 }
 0xaee   :  { %1503 = vsyncpa [#allocation12], 1 }
 0xaef   :  { %1504 = vsyncpa [#allocation15], 1 }
 0xaf0   :  { %1505 = vsyncpa [#allocation18], 1 }
 0xaf1   :  { %1506 = vsyncpa [#allocation4], 1 }
 0xaf2   :  { %1508 = vsyncpa [#allocation4 + $0x1], 1 }

</bundles_post_ra>
